<compile_context>
chip_gen: v7x
topology: tpu7x:2x2x1
jax: 0.10.0
libtpu: 0.0.40
codegen_flags: <defaults>
</compile_context>

<pallas_src>
import jax
import jax.numpy as jnp
from jax.experimental import pallas as pl
from jax.experimental.pallas import tpu as pltpu


# ----------------------------- fused Pallas kernel -----------------------------

def make_gnn_fused_kernel(num_layers):
    """Builds the fused kernel for a fixed number of SAGEConv layers.

    Ref layout (all lane-padded to width P, rows padded to Npad):
      refs[0]                 : A_cnt   (Npad, Npad) bf16  exact edge counts
      refs[1]                 : inv_deg (Npad, 1)    f32   1 / max(in_degree, 1)
      refs[2]                 : X       (Npad, P)    bf16  padded node features
      refs[3 + 3*l + 0]       : Wl_l    (P, P)       bf16
      refs[3 + 3*l + 1]       : Wr_l    (P, P)       bf16
      refs[3 + 3*l + 2]       : b_l     (1, P)       f32
      refs[3+3L .. 6+3L]      : Wm1 (bf16), bm1 (f32), Wm2 (bf16), bm2 (f32)
      refs[7+3L], refs[8+3L]  : emb (Npad, P) f32, pred (Npad, P) f32  (lane-dense)
    """
    def kernel(*refs):
        a_ref, invd_ref, x_ref = refs[0], refs[1], refs[2]
        conv_refs = refs[3:3 + 3 * num_layers]
        wm1_ref, bm1_ref, wm2_ref, bm2_ref = refs[3 + 3 * num_layers:7 + 3 * num_layers]
        emb_ref = refs[7 + 3 * num_layers]
        pred_ref = refs[8 + 3 * num_layers]

        a = a_ref[...]                       # (Npad, Npad) bf16 exact counts
        inv_deg = invd_ref[...]              # (Npad, 1)    f32
        x = x_ref[...]                       # (Npad, P)    bf16
        pre = None
        for l in range(num_layers):
            wl = conv_refs[3 * l][...]       # (P, P) bf16
            wr = conv_refs[3 * l + 1][...]   # (P, P) bf16
            b = conv_refs[3 * l + 2][...]    # (1, P) f32
            # mean-neighbor aggregation: bf16 MXU counts-matmul, f32 acc,
            # exact mean via per-row f32 scale (hides under MXU on the VPU).
            agg = jnp.dot(a, x, preferred_element_type=jnp.float32) * inv_deg
            # two MXU pushes (no concat temp):  agg @ Wl + x @ Wr + b
            pre = (jnp.dot(agg.astype(jnp.bfloat16), wl,
                           preferred_element_type=jnp.float32)
                   + jnp.dot(x, wr, preferred_element_type=jnp.float32)
                   + b)
            # ReLU; dropout(eval) = identity; keep inter-layer activations bf16
            x = jnp.maximum(pre, 0.0).astype(jnp.bfloat16)
        emb_ref[...] = pre                   # emb = last conv's pre-ReLU output (f32)

        # post_mp head: Linear -> Dropout(identity, eval) -> ReLU -> Linear
        h = jnp.maximum(
            jnp.dot(x, wm1_ref[...], preferred_element_type=jnp.float32) + bm1_ref[...],
            0.0).astype(jnp.bfloat16)
        pred_ref[...] = (jnp.dot(h, wm2_ref[...], preferred_element_type=jnp.float32)
                         + bm2_ref[...])
    return kernel


# ------------------------------ wrappers -----------------------------------

def build_adjacency_counts(edge_index, num_nodes, num_nodes_pad):
    """Dense edge-count matrix + inverse in-degree, matching PyG SAGEConv mean aggr.

    edge_index: (2, E) int array, row 0 = source j, row 1 = target i.
    A_cnt[i, j] = count(j -> i); inv_deg[i] = 1 / max(in_degree(i), 1)
    (isolated nodes get all-zero aggregation rows, exactly like scatter-mean).
    Counts are exact in bf16 for multiplicities <= 256.
    """
    src, dst = edge_index[0], edge_index[1]
    A = jnp.zeros((num_nodes_pad, num_nodes_pad), jnp.float32).at[dst, src].add(1.0)
    deg = A.sum(axis=1, keepdims=True)
    inv_deg = 1.0 / jnp.maximum(deg, 1.0)
    return A.astype(jnp.bfloat16), inv_deg.astype(jnp.float32)


def _pad2(a, rows, cols, dtype):
    """Zero-pad a 2D array to (rows, cols) and cast (zero padding keeps math exact)."""
    out = jnp.zeros((rows, cols), jnp.float32)
    out = out.at[:a.shape[0], :a.shape[1]].set(a.astype(jnp.float32))
    return out.astype(dtype)


def gnn_stack_forward(x, edge_index, params, *, lane=128):
    """Forward pass of GNNStack. Returns (emb, pred) like the PyTorch module."""
    N, in_dim = x.shape
    convs = params["convs"]
    w1, b1, w2, b2 = params["post_mp"]
    num_layers = len(convs)
    d_last = convs[-1][0].shape[1]
    out_dim = w2.shape[1]

    # lane-dense feature width (all dims here are <= 128) and sublane-friendly N
    dims = [in_dim, d_last, w1.shape[1], out_dim] + [wl.shape[1] for wl, _, _ in convs]
    P = lane * pl.cdiv(max(dims + [1]), lane)
    Npad = 8 * pl.cdiv(N, 8)

    A_cnt, inv_deg = build_adjacency_counts(edge_index, N, Npad)
    x_pad = _pad2(x, Npad, P, jnp.bfloat16)

    operands = [A_cnt, inv_deg, x_pad]
    in_specs = [pl.BlockSpec((Npad, Npad), lambda i: (0, 0)),   # A counts (bf16)
                pl.BlockSpec((Npad, 1), lambda i: (0, 0)),      # inv_deg (f32)
                pl.BlockSpec((Npad, P), lambda i: (0, 0))]      # X (bf16, padded)
    for (wl, wr, b) in convs:
        operands += [_pad2(wl, P, P, jnp.bfloat16),
                     _pad2(wr, P, P, jnp.bfloat16),
                     _pad2(b, 1, P, jnp.float32)]
        in_specs += [pl.BlockSpec((P, P), lambda i: (0, 0)),
                     pl.BlockSpec((P, P), lambda i: (0, 0)),
                     pl.BlockSpec((1, P), lambda i: (0, 0))]
    operands += [_pad2(w1, P, P, jnp.bfloat16), _pad2(b1, 1, P, jnp.float32),
                 _pad2(w2, P, P, jnp.bfloat16), _pad2(b2, 1, P, jnp.float32)]
    in_specs += [pl.BlockSpec((P, P), lambda i: (0, 0)),
                 pl.BlockSpec((1, P), lambda i: (0, 0)),
                 pl.BlockSpec((P, P), lambda i: (0, 0)),
                 pl.BlockSpec((1, P), lambda i: (0, 0))]

    # Explicit VMEM limit sized from the actual resident set (x2 for the pipeliner's
    # double buffering + headroom), capped at v7x's 64 MiB physical VMEM.
    bytes_in = sum(int(op.size) * op.dtype.itemsize for op in operands)
    bytes_out = 2 * Npad * P * 4
    vmem_limit = int(min(max(2 * (bytes_in + bytes_out) + (8 << 20), 32 << 20), 64 << 20))

    emb_pad, pred_pad = pl.pallas_call(
        make_gnn_fused_kernel(num_layers),
        out_shape=(jax.ShapeDtypeStruct((Npad, P), jnp.float32),
                   jax.ShapeDtypeStruct((Npad, P), jnp.float32)),
        grid_spec=pltpu.PrefetchScalarGridSpec(
            num_scalar_prefetch=0,
            grid=(1,),                                   # single block: everything in VMEM
            in_specs=in_specs,
            out_specs=[pl.BlockSpec((Npad, P), lambda i: (0, 0)),   # emb (lane-dense)
                       pl.BlockSpec((Npad, P), lambda i: (0, 0))],  # pred (lane-dense)
        ),
        compiler_params=pltpu.CompilerParams(
            dimension_semantics=("arbitrary",),
            vmem_limit_bytes=vmem_limit),
    )(*operands)

    return emb_pad[:N, :d_last], pred_pad[:N, :out_dim]


# ------------------------------- main ---------------------------------------

if __name__ == "__main__":
    # Module hyper-parameters (small, forward-consistent):
    #   hidden_dim_GNN = [16, 32, 32]  -> input_dim=16, 2 SAGEConv layers
    #   hidden_dim_MLP = [32], output_dim = 4, num_layers = 2
    hidden_dim_GNN = [16, 32, 32]
    hidden_dim_MLP = [32]
    output_dim = 4
    num_layers = 2

    N = 128        # number of graph nodes
    E = 512        # number of edges

    key = jax.random.PRNGKey(0)
    keys = jax.random.split(key, 16)

    x = jax.random.normal(keys[0], (N, hidden_dim_GNN[0]), jnp.float32)
    src = jax.random.randint(keys[1], (E,), 0, N)
    dst = jax.random.randint(keys[2], (E,), 0, N)
    edge_index = jnp.stack([src, dst], axis=0)

    # Deterministic parameter init (synthetic; matches __init__ shapes).
    # Linear weights stored as (in, out): kernel computes x @ W + b
    # (equivalent to PyTorch's x @ W.T + b with W of shape (out, in)).
    params = {"convs": [], "post_mp": None}
    kidx = 3
    for l in range(num_layers):
        din, dout = hidden_dim_GNN[l], hidden_dim_GNN[l + 1]
        scale = 1.0 / jnp.sqrt(jnp.float32(din))
        wl = jax.random.uniform(keys[kidx], (din, dout), jnp.float32, -scale, scale); kidx += 1
        wr = jax.random.uniform(keys[kidx], (din, dout), jnp.float32, -scale, scale); kidx += 1
        b = jax.random.uniform(keys[kidx], (1, dout), jnp.float32, -scale, scale); kidx += 1
        params["convs"].append((wl, wr, b))

    d_last, d_mlp = hidden_dim_GNN[-1], hidden_dim_MLP[0]
    s1 = 1.0 / jnp.sqrt(jnp.float32(d_last))
    s2 = 1.0 / jnp.sqrt(jnp.float32(d_mlp))
    w1 = jax.random.uniform(keys[kidx], (d_last, d_mlp), jnp.float32, -s1, s1); kidx += 1
    b1 = jax.random.uniform(keys[kidx], (1, d_mlp), jnp.float32, -s1, s1); kidx += 1
    w2 = jax.random.uniform(keys[kidx], (d_mlp, output_dim), jnp.float32, -s2, s2); kidx += 1
    b2 = jax.random.uniform(keys[kidx], (1, output_dim), jnp.float32, -s2, s2); kidx += 1
    params["post_mp"] = (w1, b1, w2, b2)

    emb, pred = gnn_stack_forward(x, edge_index, params)
    jax.block_until_ready((emb, pred))

    assert emb.shape == (N, hidden_dim_GNN[-1])
    assert pred.shape == (N, output_dim)
    print("KERNEL_OK")
</pallas_src>

<mosaic_0001>
module attributes {stable_mosaic.version = 11 : i64} {
  func.func @kernel(%arg0: i32, %arg1: memref<128x128xbf16, #tpu.memory_space<vmem>>, %arg2: memref<128x1xf32, #tpu.memory_space<vmem>>, %arg3: memref<128x128xbf16, #tpu.memory_space<vmem>>, %arg4: memref<128x128xbf16, #tpu.memory_space<vmem>>, %arg5: memref<128x128xbf16, #tpu.memory_space<vmem>>, %arg6: memref<1x128xf32, #tpu.memory_space<vmem>>, %arg7: memref<128x128xbf16, #tpu.memory_space<vmem>>, %arg8: memref<128x128xbf16, #tpu.memory_space<vmem>>, %arg9: memref<1x128xf32, #tpu.memory_space<vmem>>, %arg10: memref<128x128xbf16, #tpu.memory_space<vmem>>, %arg11: memref<1x128xf32, #tpu.memory_space<vmem>>, %arg12: memref<128x128xbf16, #tpu.memory_space<vmem>>, %arg13: memref<1x128xf32, #tpu.memory_space<vmem>>, %arg14: memref<128x128xf32, #tpu.memory_space<vmem>>, %arg15: memref<128x128xf32, #tpu.memory_space<vmem>>) attributes {dimension_semantics = [#tpu.dimension_semantics<arbitrary>], iteration_bounds = array<i64: 1>, scalar_prefetch = 0 : i64, scratch_operands = 0 : i64, tpu.core_type = #tpu.core_type<tc>, window_params = [{pipeline_mode = #tpu.pipeline_mode<synchronous>, transform_indices = @transform_0, window_bounds = array<i64: 128, 128>}, {pipeline_mode = #tpu.pipeline_mode<synchronous>, transform_indices = @transform_1, window_bounds = array<i64: 128, 1>}, {pipeline_mode = #tpu.pipeline_mode<synchronous>, transform_indices = @transform_2, window_bounds = array<i64: 128, 128>}, {pipeline_mode = #tpu.pipeline_mode<synchronous>, transform_indices = @transform_3, window_bounds = array<i64: 128, 128>}, {pipeline_mode = #tpu.pipeline_mode<synchronous>, transform_indices = @transform_4, window_bounds = array<i64: 128, 128>}, {pipeline_mode = #tpu.pipeline_mode<synchronous>, transform_indices = @transform_5, window_bounds = array<i64: 1, 128>}, {pipeline_mode = #tpu.pipeline_mode<synchronous>, transform_indices = @transform_6, window_bounds = array<i64: 128, 128>}, {pipeline_mode = #tpu.pipeline_mode<synchronous>, transform_indices = @transform_7, window_bounds = array<i64: 128, 128>}, {pipeline_mode = #tpu.pipeline_mode<synchronous>, transform_indices = @transform_8, window_bounds = array<i64: 1, 128>}, {pipeline_mode = #tpu.pipeline_mode<synchronous>, transform_indices = @transform_9, window_bounds = array<i64: 128, 128>}, {pipeline_mode = #tpu.pipeline_mode<synchronous>, transform_indices = @transform_10, window_bounds = array<i64: 1, 128>}, {pipeline_mode = #tpu.pipeline_mode<synchronous>, transform_indices = @transform_11, window_bounds = array<i64: 128, 128>}, {pipeline_mode = #tpu.pipeline_mode<synchronous>, transform_indices = @transform_12, window_bounds = array<i64: 1, 128>}, {pipeline_mode = #tpu.pipeline_mode<synchronous>, transform_indices = @transform_13, window_bounds = array<i64: 128, 128>}, {pipeline_mode = #tpu.pipeline_mode<synchronous>, transform_indices = @transform_14, window_bounds = array<i64: 128, 128>}]} {
    %c0 = arith.constant 0 : index
    %c0_0 = arith.constant 0 : index
    %0 = vector.load %arg1[%c0, %c0_0] : memref<128x128xbf16, #tpu.memory_space<vmem>>, vector<128x128xbf16>
    %c0_1 = arith.constant 0 : index
    %c0_2 = arith.constant 0 : index
    %1 = vector.load %arg2[%c0_1, %c0_2] : memref<128x1xf32, #tpu.memory_space<vmem>>, vector<128x1xf32>
    %c0_3 = arith.constant 0 : index
    %c0_4 = arith.constant 0 : index
    %2 = vector.load %arg3[%c0_3, %c0_4] : memref<128x128xbf16, #tpu.memory_space<vmem>>, vector<128x128xbf16>
    %c0_5 = arith.constant 0 : index
    %c0_6 = arith.constant 0 : index
    %3 = vector.load %arg4[%c0_5, %c0_6] : memref<128x128xbf16, #tpu.memory_space<vmem>>, vector<128x128xbf16>
    %c0_7 = arith.constant 0 : index
    %c0_8 = arith.constant 0 : index
    %4 = vector.load %arg5[%c0_7, %c0_8] : memref<128x128xbf16, #tpu.memory_space<vmem>>, vector<128x128xbf16>
    %c0_9 = arith.constant 0 : index
    %c0_10 = arith.constant 0 : index
    %5 = vector.load %arg6[%c0_9, %c0_10] : memref<1x128xf32, #tpu.memory_space<vmem>>, vector<1x128xf32>
    %cst = arith.constant dense<0.000000e+00> : vector<128x128xf32>
    %6 = tpu.matmul %0, %2, %cst {dimension_numbers = #tpu.dot_dimension_numbers<[1], [0], [0], [1], [0, 0, 1, 1], [], []>} : vector<128x128xbf16>, vector<128x128xbf16>, vector<128x128xf32> -> vector<128x128xf32>
    %7 = vector.broadcast %1 : vector<128x1xf32> to vector<128x128xf32>
    %8 = arith.mulf %6, %7 : vector<128x128xf32>
    %9 = arith.truncf %8 : vector<128x128xf32> to vector<128x128xbf16>
    %cst_11 = arith.constant dense<0.000000e+00> : vector<128x128xf32>
    %10 = tpu.matmul %9, %3, %cst_11 {dimension_numbers = #tpu.dot_dimension_numbers<[1], [0], [0], [1], [0, 0, 1, 1], [], []>} : vector<128x128xbf16>, vector<128x128xbf16>, vector<128x128xf32> -> vector<128x128xf32>
    %cst_12 = arith.constant dense<0.000000e+00> : vector<128x128xf32>
    %11 = tpu.matmul %2, %4, %cst_12 {dimension_numbers = #tpu.dot_dimension_numbers<[1], [0], [0], [1], [0, 0, 1, 1], [], []>} : vector<128x128xbf16>, vector<128x128xbf16>, vector<128x128xf32> -> vector<128x128xf32>
    %12 = arith.addf %10, %11 : vector<128x128xf32>
    %13 = vector.broadcast %5 : vector<1x128xf32> to vector<128x128xf32>
    %14 = arith.addf %12, %13 : vector<128x128xf32>
    %cst_13 = arith.constant 0.000000e+00 : f32
    %15 = vector.broadcast %cst_13 : f32 to vector<128x128xf32>
    %16 = arith.maximumf %14, %15 : vector<128x128xf32>
    %17 = arith.truncf %16 : vector<128x128xf32> to vector<128x128xbf16>
    %c0_14 = arith.constant 0 : index
    %c0_15 = arith.constant 0 : index
    %18 = vector.load %arg7[%c0_14, %c0_15] : memref<128x128xbf16, #tpu.memory_space<vmem>>, vector<128x128xbf16>
    %c0_16 = arith.constant 0 : index
    %c0_17 = arith.constant 0 : index
    %19 = vector.load %arg8[%c0_16, %c0_17] : memref<128x128xbf16, #tpu.memory_space<vmem>>, vector<128x128xbf16>
    %c0_18 = arith.constant 0 : index
    %c0_19 = arith.constant 0 : index
    %20 = vector.load %arg9[%c0_18, %c0_19] : memref<1x128xf32, #tpu.memory_space<vmem>>, vector<1x128xf32>
    %cst_20 = arith.constant dense<0.000000e+00> : vector<128x128xf32>
    %21 = tpu.matmul %0, %17, %cst_20 {dimension_numbers = #tpu.dot_dimension_numbers<[1], [0], [0], [1], [0, 0, 1, 1], [], []>} : vector<128x128xbf16>, vector<128x128xbf16>, vector<128x128xf32> -> vector<128x128xf32>
    %22 = vector.broadcast %1 : vector<128x1xf32> to vector<128x128xf32>
    %23 = arith.mulf %21, %22 : vector<128x128xf32>
    %24 = arith.truncf %23 : vector<128x128xf32> to vector<128x128xbf16>
    %cst_21 = arith.constant dense<0.000000e+00> : vector<128x128xf32>
    %25 = tpu.matmul %24, %18, %cst_21 {dimension_numbers = #tpu.dot_dimension_numbers<[1], [0], [0], [1], [0, 0, 1, 1], [], []>} : vector<128x128xbf16>, vector<128x128xbf16>, vector<128x128xf32> -> vector<128x128xf32>
    %cst_22 = arith.constant dense<0.000000e+00> : vector<128x128xf32>
    %26 = tpu.matmul %17, %19, %cst_22 {dimension_numbers = #tpu.dot_dimension_numbers<[1], [0], [0], [1], [0, 0, 1, 1], [], []>} : vector<128x128xbf16>, vector<128x128xbf16>, vector<128x128xf32> -> vector<128x128xf32>
    %27 = arith.addf %25, %26 : vector<128x128xf32>
    %28 = vector.broadcast %20 : vector<1x128xf32> to vector<128x128xf32>
    %29 = arith.addf %27, %28 : vector<128x128xf32>
    %cst_23 = arith.constant 0.000000e+00 : f32
    %30 = vector.broadcast %cst_23 : f32 to vector<128x128xf32>
    %31 = arith.maximumf %29, %30 : vector<128x128xf32>
    %32 = arith.truncf %31 : vector<128x128xf32> to vector<128x128xbf16>
    %c0_24 = arith.constant 0 : index
    %c0_25 = arith.constant 0 : index
    %33 = vector.load %arg14[%c0_24, %c0_25] : memref<128x128xf32, #tpu.memory_space<vmem>>, vector<128x128xf32>
    tpu.vector_store %arg14[%c0_24, %c0_25], %29 {strides = array<i32>} : memref<128x128xf32, #tpu.memory_space<vmem>>, vector<128x128xf32>,
    %c0_26 = arith.constant 0 : index
    %c0_27 = arith.constant 0 : index
    %34 = vector.load %arg10[%c0_26, %c0_27] : memref<128x128xbf16, #tpu.memory_space<vmem>>, vector<128x128xbf16>
    %cst_28 = arith.constant dense<0.000000e+00> : vector<128x128xf32>
    %35 = tpu.matmul %32, %34, %cst_28 {dimension_numbers = #tpu.dot_dimension_numbers<[1], [0], [0], [1], [0, 0, 1, 1], [], []>} : vector<128x128xbf16>, vector<128x128xbf16>, vector<128x128xf32> -> vector<128x128xf32>
    %c0_29 = arith.constant 0 : index
    %c0_30 = arith.constant 0 : index
    %36 = vector.load %arg11[%c0_29, %c0_30] : memref<1x128xf32, #tpu.memory_space<vmem>>, vector<1x128xf32>
    %37 = vector.broadcast %36 : vector<1x128xf32> to vector<128x128xf32>
    %38 = arith.addf %35, %37 : vector<128x128xf32>
    %cst_31 = arith.constant 0.000000e+00 : f32
    %39 = vector.broadcast %cst_31 : f32 to vector<128x128xf32>
    %40 = arith.maximumf %38, %39 : vector<128x128xf32>
    %41 = arith.truncf %40 : vector<128x128xf32> to vector<128x128xbf16>
    %c0_32 = arith.constant 0 : index
    %c0_33 = arith.constant 0 : index
    %42 = vector.load %arg12[%c0_32, %c0_33] : memref<128x128xbf16, #tpu.memory_space<vmem>>, vector<128x128xbf16>
    %cst_34 = arith.constant dense<0.000000e+00> : vector<128x128xf32>
    %43 = tpu.matmul %41, %42, %cst_34 {dimension_numbers = #tpu.dot_dimension_numbers<[1], [0], [0], [1], [0, 0, 1, 1], [], []>} : vector<128x128xbf16>, vector<128x128xbf16>, vector<128x128xf32> -> vector<128x128xf32>
    %c0_35 = arith.constant 0 : index
    %c0_36 = arith.constant 0 : index
    %44 = vector.load %arg13[%c0_35, %c0_36] : memref<1x128xf32, #tpu.memory_space<vmem>>, vector<1x128xf32>
    %45 = vector.broadcast %44 : vector<1x128xf32> to vector<128x128xf32>
    %46 = arith.addf %43, %45 : vector<128x128xf32>
    %c0_37 = arith.constant 0 : index
    %c0_38 = arith.constant 0 : index
    %47 = vector.load %arg15[%c0_37, %c0_38] : memref<128x128xf32, #tpu.memory_space<vmem>>, vector<128x128xf32>
    tpu.vector_store %arg15[%c0_37, %c0_38], %46 {strides = array<i32>} : memref<128x128xf32, #tpu.memory_space<vmem>>, vector<128x128xf32>,
    return
  }
  func.func @transform_0(%arg0: i32) -> (i32, i32) {
    %c0_i32 = arith.constant 0 : i32
    %c0_i32_0 = arith.constant 0 : i32
    %c0_i32_1 = arith.constant 0 : i32
    return %c0_i32, %c0_i32_0 : i32, i32
  }
  func.func @transform_1(%arg0: i32) -> (i32, i32) {
    %c0_i32 = arith.constant 0 : i32
    %c0_i32_0 = arith.constant 0 : i32
    %c0_i32_1 = arith.constant 0 : i32
    return %c0_i32, %c0_i32_0 : i32, i32
  }
  func.func @transform_2(%arg0: i32) -> (i32, i32) {
    %c0_i32 = arith.constant 0 : i32
    %c0_i32_0 = arith.constant 0 : i32
    %c0_i32_1 = arith.constant 0 : i32
    return %c0_i32, %c0_i32_0 : i32, i32
  }
  func.func @transform_3(%arg0: i32) -> (i32, i32) {
    %c0_i32 = arith.constant 0 : i32
    %c0_i32_0 = arith.constant 0 : i32
    %c0_i32_1 = arith.constant 0 : i32
    return %c0_i32, %c0_i32_0 : i32, i32
  }
  func.func @transform_4(%arg0: i32) -> (i32, i32) {
    %c0_i32 = arith.constant 0 : i32
    %c0_i32_0 = arith.constant 0 : i32
    %c0_i32_1 = arith.constant 0 : i32
    return %c0_i32, %c0_i32_0 : i32, i32
  }
  func.func @transform_5(%arg0: i32) -> (i32, i32) {
    %c0_i32 = arith.constant 0 : i32
    %c0_i32_0 = arith.constant 0 : i32
    %c0_i32_1 = arith.constant 0 : i32
    return %c0_i32, %c0_i32_0 : i32, i32
  }
  func.func @transform_6(%arg0: i32) -> (i32, i32) {
    %c0_i32 = arith.constant 0 : i32
    %c0_i32_0 = arith.constant 0 : i32
    %c0_i32_1 = arith.constant 0 : i32
    return %c0_i32, %c0_i32_0 : i32, i32
  }
  func.func @transform_7(%arg0: i32) -> (i32, i32) {
    %c0_i32 = arith.constant 0 : i32
    %c0_i32_0 = arith.constant 0 : i32
    %c0_i32_1 = arith.constant 0 : i32
    return %c0_i32, %c0_i32_0 : i32, i32
  }
  func.func @transform_8(%arg0: i32) -> (i32, i32) {
    %c0_i32 = arith.constant 0 : i32
    %c0_i32_0 = arith.constant 0 : i32
    %c0_i32_1 = arith.constant 0 : i32
    return %c0_i32, %c0_i32_0 : i32, i32
  }
  func.func @transform_9(%arg0: i32) -> (i32, i32) {
    %c0_i32 = arith.constant 0 : i32
    %c0_i32_0 = arith.constant 0 : i32
    %c0_i32_1 = arith.constant 0 : i32
    return %c0_i32, %c0_i32_0 : i32, i32
  }
  func.func @transform_10(%arg0: i32) -> (i32, i32) {
    %c0_i32 = arith.constant 0 : i32
    %c0_i32_0 = arith.constant 0 : i32
    %c0_i32_1 = arith.constant 0 : i32
    return %c0_i32, %c0_i32_0 : i32, i32
  }
  func.func @transform_11(%arg0: i32) -> (i32, i32) {
    %c0_i32 = arith.constant 0 : i32
    %c0_i32_0 = arith.constant 0 : i32
    %c0_i32_1 = arith.constant 0 : i32
    return %c0_i32, %c0_i32_0 : i32, i32
  }
  func.func @transform_12(%arg0: i32) -> (i32, i32) {
    %c0_i32 = arith.constant 0 : i32
    %c0_i32_0 = arith.constant 0 : i32
    %c0_i32_1 = arith.constant 0 : i32
    return %c0_i32, %c0_i32_0 : i32, i32
  }
  func.func @transform_13(%arg0: i32) -> (i32, i32) {
    %c0_i32 = arith.constant 0 : i32
    %c0_i32_0 = arith.constant 0 : i32
    %c0_i32_1 = arith.constant 0 : i32
    return %c0_i32, %c0_i32_0 : i32, i32
  }
  func.func @transform_14(%arg0: i32) -> (i32, i32) {
    %c0_i32 = arith.constant 0 : i32
    %c0_i32_0 = arith.constant 0 : i32
    %c0_i32_1 = arith.constant 0 : i32
    return %c0_i32, %c0_i32_0 : i32, i32
  }
}

</mosaic_0001>

<bundles_post_ra>
// kernel: tpu_custom_call.1
= control target key start
LH: loop header
LB: loop body
LE: loop exit
PB: predicated region body
PF: predicated region fallthrough
CT: control target
= control target key end

     0   :  { %20 = vsyncpa [#allocation3], 0  ;;  %s3030_s0 = inlined_call_operand.vmem [shape: bf16[128,128], index: 0, kind: input, shape index: {}]   ;;  %s3031_s1 = inlined_call_operand.vmem [shape: f32[128,1], index: 1, kind: input, shape index: {}]   ;;  %s3032_s2 = inlined_call_operand.vmem [shape: bf16[128,128], index: 2, kind: input, shape index: {}]   ;;  %s3033_s3 = inlined_call_operand.hbm [shape: bf16[128,128], index: 3, kind: input, shape index: {}]   ;;  %s3034_s4 = inlined_call_operand.hbm [shape: bf16[128,128], index: 4, kind: input, shape index: {}]   ;;  %s3035_s5 = inlined_call_operand.vmem [shape: f32[1,128], index: 5, kind: input, shape index: {}]   ;;  %s3036_s6 = inlined_call_operand.hbm [shape: bf16[128,128], index: 6, kind: input, shape index: {}]   ;;  %s3037_s7 = inlined_call_operand.hbm [shape: bf16[128,128], index: 7, kind: input, shape index: {}]   ;;  %s3038_s8 = inlined_call_operand.vmem [shape: f32[1,128], index: 8, kind: input, shape index: {}]   ;;  %s3039_s9 = inlined_call_operand.hbm [shape: bf16[128,128], index: 9, kind: input, shape index: {}]   ;;  %s3040_s10 = inlined_call_operand.vmem [shape: f32[1,128], index: 10, kind: input, shape index: {}]   ;;  %s3041_s11 = inlined_call_operand.hbm [shape: bf16[128,128], index: 11, kind: input, shape index: {}]   ;;  %s3042_s12 = inlined_call_operand.vmem [shape: f32[1,128], index: 12, kind: input, shape index: {}]   ;;  %s3043_s13 = inlined_call_operand.hbm [shape: f32[128,128], index: 13, kind: output, shape index: {0}]   ;;  %s3044_s14 = inlined_call_operand.hbm [shape: f32[128,128], index: 14, kind: output, shape index: {1}]  }
   0x1   :  { %21 = vsyncpa [#allocation6], 0 }
   0x2   :  { %22 = vsyncpa [#allocation9], 0 }
   0x3   :  { %23 = vsyncpa [#allocation12], 0 }
   0x4   :  { %24 = vsyncpa [#allocation4], 0 }
   0x5   :  { %25 = vsyncpa [#allocation15], 0  ;;  %s2514_s29 = smov [#allocation5]   ;;  %s2515_s15 = smov [#allocation8]  }
   0x6   :  { %s49_s30 = sshll.u32 %s2514_s29, 4  ;;  %s75_s16 = sshll.u32 %s2515_s15, 4  ;;  %s50_s30 = int_to_ptr.vmem [resolvable:$true] %s49_s30  ;;  %s2602_s16 = int_to_ptr.vmem [resolvable:$true] %s75_s16 }
   0x7   :  { %s2326_s19 = scalar_lea.hbm %s3034_s4, 1024 }
   0x8   :  { %p2327_p0 = scmp.ne.s32.totalorder %s3034_s4, %s2326_s19  ;;  %p2330_p1 = scmp.lt.u32.totalorder %s2326_s19, %s3034_s4 }
   0xa   :  { %p2332_p2 = pnand %p2330_p1, %p2327_p0 }
   0xc   :  { %2335 = shalt.err (!%p2332_p2)
}
   0xd   :  { %s2336_s24 = scalar_lea.vmem %s50_s30, 1024  ;;  %p2341_p4 = scmp.lt.s32.totalorder %s50_s30, %s50_s30 }
   0xe   :  { %p2337_p3 = scmp.ne.s32.totalorder %s50_s30, %s2336_s24  ;;  %p2342_p5 = scmp.lt.s32.totalorder %s2336_s24, %s2336_s24 }
  0x10   :  { %p2343_p6 = por %p2342_p5, %p2341_p4 }
  0x12   :  { %p2344_p7 = pnand %p2343_p6, %p2337_p3 }
  0x14   :  { %2347 = shalt.err (!%p2344_p7)
}
  0x15   :  { %s2516_s25 = smov 64   ;;  %s2517_s26 = smov 4  }
  0x16   :  { %55 = dma.hbm_to_vmem [thread:$0]  %s3034_s4, 1024, %s50_s30, [#allocation6], %s2516_s25, %s2516_s25, %s2517_s26  }
  0x17   :  { %s2348_s17 = scalar_lea.hbm %s3037_s7, 1024 }
  0x18   :  { %p2349_p8 = scmp.ne.s32.totalorder %s3037_s7, %s2348_s17  ;;  %p2352_p9 = scmp.lt.u32.totalorder %s2348_s17, %s3037_s7 }
  0x1a   :  { %p2354_p10 = pnand %p2352_p9, %p2349_p8 }
  0x1c   :  { %2357 = shalt.err (!%p2354_p10)
}
  0x1d   :  { %s2358_s22 = scalar_lea.vmem %s2602_s16, 1024  ;;  %p2363_p12 = scmp.lt.s32.totalorder %s2602_s16, %s2602_s16 }
  0x1e   :  { %p2359_p11 = scmp.ne.s32.totalorder %s2602_s16, %s2358_s22  ;;  %p2364_p13 = scmp.lt.s32.totalorder %s2358_s22, %s2358_s22 }
  0x20   :  { %p2365_p0 = por %p2364_p13, %p2363_p12 }
  0x22   :  { %p2366_p1 = pnand %p2365_p0, %p2359_p11 }
  0x24   :  { %2369 = shalt.err (!%p2366_p1)
}
  0x25   :  { %81 = dma.hbm_to_vmem [thread:$0]  %s3037_s7, 1024, %s2602_s16, [#allocation9], %s2516_s25, %s2516_s25, %s2517_s26  }
  0x26   :  { %s2518_s23 = smov [#allocation2]   ;;  %s2519_s27 = smov [#allocation7]  }
  0x27   :  { %s37_s24 = sshll.u32 %s2518_s23, 4  ;;  %s63_s28 = sshll.u32 %s2519_s27, 4  ;;  %s38_s24 = int_to_ptr.vmem [resolvable:$true] %s37_s24  ;;  %s2639_s28 = int_to_ptr.vmem [resolvable:$true] %s63_s28 }
  0x28   :  { %s2370_s17 = scalar_lea.hbm %s3033_s3, 1024 }
  0x29   :  { %p2371_p2 = scmp.ne.s32.totalorder %s3033_s3, %s2370_s17  ;;  %p2374_p3 = scmp.lt.u32.totalorder %s2370_s17, %s3033_s3 }
  0x2b   :  { %p2376_p4 = pnand %p2374_p3, %p2371_p2 }
  0x2d   :  { %2379 = shalt.err (!%p2376_p4)
}
  0x2e   :  { %s2380_s7 = scalar_lea.vmem %s38_s24, 1024  ;;  %p2385_p6 = scmp.lt.s32.totalorder %s38_s24, %s38_s24 }
  0x2f   :  { %p2381_p5 = scmp.ne.s32.totalorder %s38_s24, %s2380_s7  ;;  %p2386_p7 = scmp.lt.s32.totalorder %s2380_s7, %s2380_s7 }
  0x31   :  { %p2387_p8 = por %p2386_p7, %p2385_p6 }
  0x33   :  { %p2388_p9 = pnand %p2387_p8, %p2381_p5 }
  0x35   :  { %2391 = shalt.err (!%p2388_p9)
}
  0x36   :  { %43 = dma.hbm_to_vmem [thread:$0]  %s3033_s3, 1024, %s38_s24, [#allocation3], %s2516_s25, %s2516_s25, %s2517_s26  }
  0x37   :  { %s2392_s23 = scalar_lea.hbm %s3036_s6, 1024 }
  0x38   :  { %p2393_p10 = scmp.ne.s32.totalorder %s3036_s6, %s2392_s23  ;;  %p2396_p11 = scmp.lt.u32.totalorder %s2392_s23, %s3036_s6 }
  0x3a   :  { %p2398_p12 = pnand %p2396_p11, %p2393_p10 }
  0x3c   :  { %2401 = shalt.err (!%p2398_p12)
}
  0x3d   :  { %s2402_s18 = scalar_lea.vmem %s2639_s28, 1024  ;;  %p2407_p0 = scmp.lt.s32.totalorder %s2639_s28, %s2639_s28 }
  0x3e   :  { %p2403_p13 = scmp.ne.s32.totalorder %s2639_s28, %s2402_s18  ;;  %p2408_p1 = scmp.lt.s32.totalorder %s2402_s18, %s2402_s18 }
  0x40   :  { %p2409_p2 = por %p2408_p1, %p2407_p0 }
  0x42   :  { %p2410_p3 = pnand %p2409_p2, %p2403_p13 }
  0x44   :  { %2413 = shalt.err (!%p2410_p3)
}
  0x45   :  { %69 = dma.hbm_to_vmem [thread:$0]  %s3036_s6, 1024, %s2639_s28, [#allocation6], %s2516_s25, %s2516_s25, %s2517_s26  }
  0x46   :  { %s2520_s19 = smov [#allocation10]   ;;  %s2521_s21 = smov [#allocation11]  }
  0x47   :  { %s89_s20 = sshll.u32 %s2520_s19, 4  ;;  %s103_s7 = sshll.u32 %s2521_s21, 4  ;;  %s90_s20 = int_to_ptr.vmem [resolvable:$true] %s89_s20  ;;  %s2676_s7 = int_to_ptr.vmem [resolvable:$true] %s103_s7 }
  0x48   :  { %s2414_s4 = scalar_lea.hbm %s3039_s9, 1024 }
  0x49   :  { %p2415_p4 = scmp.ne.s32.totalorder %s3039_s9, %s2414_s4  ;;  %p2418_p5 = scmp.lt.u32.totalorder %s2414_s4, %s3039_s9 }
  0x4b   :  { %p2420_p6 = pnand %p2418_p5, %p2415_p4 }
  0x4d   :  { %2423 = shalt.err (!%p2420_p6)
}
  0x4e   :  { %s2424_s6 = scalar_lea.vmem %s90_s20, 1024  ;;  %p2429_p8 = scmp.lt.s32.totalorder %s90_s20, %s90_s20 }
  0x4f   :  { %p2425_p7 = scmp.ne.s32.totalorder %s90_s20, %s2424_s6  ;;  %p2430_p9 = scmp.lt.s32.totalorder %s2424_s6, %s2424_s6 }
  0x51   :  { %p2431_p10 = por %p2430_p9, %p2429_p8 }
  0x53   :  { %p2432_p11 = pnand %p2431_p10, %p2425_p7 }
  0x55   :  { %2435 = shalt.err (!%p2432_p11)
}
  0x56   :  { %95 = dma.hbm_to_vmem [thread:$0]  %s3039_s9, 1024, %s90_s20, [#allocation9], %s2516_s25, %s2516_s25, %s2517_s26  }
  0x57   :  { %s2436_s3 = scalar_lea.hbm %s3041_s11, 1024 }
  0x58   :  { %p2437_p12 = scmp.ne.s32.totalorder %s3041_s11, %s2436_s3  ;;  %p2440_p13 = scmp.lt.u32.totalorder %s2436_s3, %s3041_s11 }
  0x5a   :  { %p2442_p0 = pnand %p2440_p13, %p2437_p12 }
  0x5c   :  { %2445 = shalt.err (!%p2442_p0)
}
  0x5d   :  { %s2446_s22 = scalar_lea.vmem %s2676_s7, 1024  ;;  %p2451_p2 = scmp.lt.s32.totalorder %s2676_s7, %s2676_s7 }
  0x5e   :  { %p2447_p1 = scmp.ne.s32.totalorder %s2676_s7, %s2446_s22  ;;  %p2452_p3 = scmp.lt.s32.totalorder %s2446_s22, %s2446_s22 }
  0x60   :  { %p2453_p4 = por %p2452_p3, %p2451_p2 }
  0x62   :  { %p2454_p5 = pnand %p2453_p4, %p2447_p1 }
  0x64   :  { %2457 = shalt.err (!%p2454_p5)
}
  0x65   :  { %109 = dma.hbm_to_vmem [thread:$0]  %s3041_s11, 1024, %s2676_s7, [#allocation12], %s2516_s25, %s2516_s25, %s2517_s26  }
  0x66   :  { %2502 = dma.done.wait [#allocation3], 1024  }
  0x67   :  { %2503 = vsyncadd [#allocation3], 4294966272 }
  0x68   :  { %2504 = dma.done.wait [#allocation6], 2048  }
  0x69   :  { %2505 = vsyncadd [#allocation6], 4294965248 }
  0x6a   :  { %2506 = dma.done.wait [#allocation9], 2048  }
  0x6b   :  { %2507 = vsyncadd [#allocation9], 4294965248 }
  0x6c   :  { %2508 = dma.done.wait [#allocation12], 1024  }
  0x6d   :  { %2509 = vsyncadd [#allocation12], 4294966272  ;;  %v2522_v0 = vmov 0   ;;  %v2262_v1 = vld [vmem:[%s3032_s2] sm:$0xff]   ;;  %v2719_v2 = vld [vmem:[%s3032_s2 + $0x8] sm:$0xff]  }
  0x6e   :  { %2260 = vset.pattern.permute.xlu0 %v2522_v0  ;;  %2261 = vset.pattern.permute.xlu1 %v2522_v0  ;;  %v2725_v3 = vld [vmem:[%s3032_s2 + $0x10] sm:$0xff]   ;;  %v2731_v4 = vld [vmem:[%s3032_s2 + $0x18] sm:$0xff]   ;;  %v2737_v5 = vld [vmem:[%s3030_s0] sm:$0xff]  }
  0x6f   :  { %1959 = vmatprep.subr.bf16.mxu0 %v2262_v1  ;;  %2007 = vmatprep.mubr.bf16.mxu1 %v2262_v1  ;;  %v2745_v6 = vld [vmem:[%s3032_s2 + $0x20] sm:$0xff]   ;;  %v2752_v7 = vld [vmem:[%s3032_s2 + $0x28] sm:$0xff]   ;;  %v149_v9 = vld [vmem:[%s3031_s1 + $0x10] sm:$0xff] }
  0x70   :  { %1960 = vmatpush3.bf16.msra.mxu0 %v2262_v1  ;;  %1975 = vmatprep.mubr.bf16.mxu0 %v2737_v5  ;;  %v147_v8 = vld [vmem:[%s3031_s1] sm:$0xff]  ;;  %v148_v10 = vld [vmem:[%s3031_s1 + $0x8] sm:$0xff]  ;;  %v150_v11 = vld [vmem:[%s3031_s1 + $0x18] sm:$0xff] }
  0x71   :  { %1961 = vmatprep.subr.bf16.mxu0 %v2719_v2  ;;  %407 = vperm.xlu0 %2260, %v147_v8   ;;  %v2771_v12 = vld [vmem:[%s3032_s2 + $0x30] sm:$0xff]   ;;  %v151_v13 = vld [vmem:[%s3031_s1 + $0x20] sm:$0xff]  ;;  %v152_v14 = vld [vmem:[%s3031_s1 + $0x28] sm:$0xff] }
  0x72   :  { %417 = vperm.xlu1 %2261, %v149_v9   ;;  %v2278_v15 = vld [vmem:[#allocation5] sm:$0xff]   ;;  %v2279_v16 = vld [vmem:[#allocation5 + $0x8] sm:$0xff]   ;;  %v2784_v17 = vld [vmem:[%s3032_s2 + $0x38] sm:$0xff]  }
  0x73   :  { %1991 = vmatprep.subr.bf16.mxu1 %v2278_v15  ;;  %v153_v18 = vld [vmem:[%s3031_s1 + $0x30] sm:$0xff]  ;;  %v154_v19 = vld [vmem:[%s3031_s1 + $0x38] sm:$0xff]  ;;  %v2797_v21 = vld [vmem:[%s3030_s0 + $0x8] sm:$0xff]  }
  0x74   :  { %1962 = vmatpush3.bf16.msra.mxu0 %v2719_v2  ;;  %1992 = vmatpush3.bf16.msra.mxu1 %v2278_v15  ;;  %v2280_v20 = vld [vmem:[#allocation5 + $0x10] sm:$0xff]   ;;  %v155_v23 = vld [vmem:[%s3031_s1 + $0x40] sm:$0xff]  ;;  %v156_v24 = vld [vmem:[%s3031_s1 + $0x48] sm:$0xff] }
  0x75   :  { %1963 = vmatprep.subr.bf16.mxu0 %v2725_v3  ;;  %412 = vperm.xlu0 %2260, %v148_v10   ;;  %v2802_v22 = vld [vmem:[%s3030_s0 + $0x10] sm:$0xff]   ;;  %v2281_v25 = vld [vmem:[#allocation5 + $0x18] sm:$0xff]   ;;  %v2282_v28 = vld [vmem:[#allocation5 + $0x20] sm:$0xff]  }
  0x76   :  { %422 = vperm.xlu1 %2261, %v150_v11   ;;  %1993 = vmatprep.subr.bf16.mxu1 %v2279_v16  ;;  %v157_v26 = vld [vmem:[%s3031_s1 + $0x50] sm:$0xff]  ;;  %v158_v27 = vld [vmem:[%s3031_s1 + $0x58] sm:$0xff]  ;;  %v159_v30 = vld [vmem:[%s3031_s1 + $0x60] sm:$0xff] }
  0x77   :  { %v2822_v29 = vld [vmem:[%s3030_s0 + $0x18] sm:$0xff]   ;;  %v160_v31 = vld [vmem:[%s3031_s1 + $0x68] sm:$0xff]  ;;  %v2833_v32 = vld [vmem:[%s3030_s0 + $0x20] sm:$0xff]  }
  0x78   :  { %1964 = vmatpush3.bf16.msra.mxu0 %v2725_v3  ;;  %1994 = vmatpush3.bf16.msra.mxu1 %v2279_v16  ;;  %v2283_v33 = vld [vmem:[#allocation5 + $0x28] sm:$0xff]   ;;  %v161_v34 = vld [vmem:[%s3031_s1 + $0x70] sm:$0xff]  ;;  %v162_v35 = vld [vmem:[%s3031_s1 + $0x78] sm:$0xff] }
  0x79   :  { %1965 = vmatprep.subr.bf16.mxu0 %v2731_v4  ;;  %427 = vperm.xlu0 %2260, %v151_v13   ;;  %v2284_v36 = vld [vmem:[#allocation5 + $0x30] sm:$0xff]   ;;  %v2846_v37 = vld [vmem:[%s3030_s0 + $0x28] sm:$0xff]   ;;  %v2285_v39 = vld [vmem:[#allocation5 + $0x38] sm:$0xff]  }
  0x7a   :  { %432 = vperm.xlu1 %2261, %v152_v14   ;;  %1995 = vmatprep.subr.bf16.mxu1 %v2280_v20  ;;  %v2851_v38 = vld [vmem:[%s3030_s0 + $0x30] sm:$0xff]   ;;  %v2286_v40 = vld [vmem:[#allocation2] sm:$0xff]   ;;  %v2858_v41 = vld [vmem:[%s3030_s0 + $0x38] sm:$0xff]  }
  0x7b   :  { %v2287_v42 = vld [vmem:[#allocation2 + $0x8] sm:$0xff]   ;;  %v2288_v43 = vld [vmem:[#allocation2 + $0x10] sm:$0xff]   ;;  %v2289_v44 = vld [vmem:[#allocation2 + $0x18] sm:$0xff]  }
  0x7c   :  { %1966 = vmatpush3.bf16.msra.mxu0 %v2731_v4  ;;  %1996 = vmatpush3.bf16.msra.mxu1 %v2280_v20  ;;  %v2290_v45 = vld [vmem:[#allocation2 + $0x20] sm:$0xff]   ;;  %v2291_v46 = vld [vmem:[#allocation2 + $0x28] sm:$0xff]   ;;  %v2292_v47 = vld [vmem:[#allocation2 + $0x30] sm:$0xff]  }
  0x7d   :  { %1967 = vmatprep.subr.bf16.mxu0 %v2745_v6  ;;  %437 = vperm.xlu0 %2260, %v153_v18   ;;  %v2293_v48 = vld [vmem:[#allocation2 + $0x38] sm:$0xff]  }
  0x7e   :  { %442 = vperm.xlu1 %2261, %v154_v19   ;;  %1997 = vmatprep.subr.bf16.mxu1 %v2281_v25 }
  0x80   :  { %1968 = vmatpush3.bf16.msra.mxu0 %v2745_v6  ;;  %1998 = vmatpush3.bf16.msra.mxu1 %v2281_v25 }
  0x81   :  { %1969 = vmatprep.subr.bf16.mxu0 %v2752_v7  ;;  %447 = vperm.xlu0 %2260, %v155_v23  }
  0x82   :  { %452 = vperm.xlu1 %2261, %v156_v24   ;;  %1999 = vmatprep.subr.bf16.mxu1 %v2282_v28 }
  0x84   :  { %1970 = vmatpush3.bf16.msra.mxu0 %v2752_v7  ;;  %2000 = vmatpush3.bf16.msra.mxu1 %v2282_v28 }
  0x85   :  { %1971 = vmatprep.subr.bf16.mxu0 %v2771_v12  ;;  %457 = vperm.xlu0 %2260, %v157_v26  }
  0x86   :  { %462 = vperm.xlu1 %2261, %v158_v27   ;;  %2001 = vmatprep.subr.bf16.mxu1 %v2283_v33 }
  0x88   :  { %1972 = vmatpush3.bf16.msra.mxu0 %v2771_v12  ;;  %2002 = vmatpush3.bf16.msra.mxu1 %v2283_v33 }
  0x89   :  { %1973 = vmatprep.subr.bf16.mxu0 %v2784_v17  ;;  %467 = vperm.xlu0 %2260, %v159_v30  }
  0x8a   :  { %472 = vperm.xlu1 %2261, %v160_v31   ;;  %2003 = vmatprep.subr.bf16.mxu1 %v2284_v36 }
  0x8c   :  { %1974 = vmatpush3.bf16.msra.mxu0 %v2784_v17  ;;  %2004 = vmatpush3.bf16.msra.mxu1 %v2284_v36 }
  0x8d   :  { %477 = vperm.xlu0 %2260, %v161_v34   ;;  %2005 = vmatprep.subr.bf16.mxu1 %v2285_v39 }
  0x8e   :  { %482 = vperm.xlu1 %2261, %v162_v35  }
  0x8f   :  { %1976 = vmatmul.mubr.bf16.vlgmr.msra.gmra.mrb[0].mxu0 %v2797_v21 }
  0x90   :  { %1979 = vmatprep.mubr.bf16.mxu0 %v2802_v22  ;;  %2006 = vmatpush3.bf16.msra.mxu1 %v2285_v39 }
  0x91   :  { %2023 = vmatprep.subr.bf16.mxu1 %v2286_v40 }
  0x93   :  { %2008 = vmatmul.mubr.bf16.vlgmr.msra.gmra.mrb[0].mxu1 %v2719_v2 }
  0x94   :  { %2024 = vmatpush3.bf16.msra.mxu1 %v2286_v40  ;;  %2011 = vmatprep.mubr.bf16.mxu1 %v2725_v3 }
  0x95   :  { %2025 = vmatprep.subr.bf16.mxu1 %v2287_v42 }
  0x97   :  { %1980 = vmatmul.mubr.bf16.gmra.mrb[4].mxu0 %v2822_v29 }
  0x98   :  { %1983 = vmatprep.mubr.bf16.mxu0 %v2833_v32  ;;  %2026 = vmatpush3.bf16.msra.mxu1 %v2287_v42 }
  0x99   :  { %2027 = vmatprep.subr.bf16.mxu1 %v2288_v43 }
  0x9b   :  { %2012 = vmatmul.mubr.bf16.gmra.mrb[4].mxu1 %v2731_v4 }
  0x9c   :  { %2028 = vmatpush3.bf16.msra.mxu1 %v2288_v43  ;;  %2015 = vmatprep.mubr.bf16.mxu1 %v2745_v6 }
  0x9d   :  { %2029 = vmatprep.subr.bf16.mxu1 %v2289_v44 }
  0x9f   :  { %1984 = vmatmul.mubr.bf16.gmra.mrb[8].mxu0 %v2846_v37 }
  0xa0   :  { %1987 = vmatprep.mubr.bf16.mxu0 %v2851_v38  ;;  %2030 = vmatpush3.bf16.msra.mxu1 %v2289_v44 }
  0xa1   :  { %2031 = vmatprep.subr.bf16.mxu1 %v2290_v45 }
  0xa3   :  { %2016 = vmatmul.mubr.bf16.gmra.mrb[8].mxu1 %v2752_v7 }
  0xa4   :  { %2032 = vmatpush3.bf16.msra.mxu1 %v2290_v45  ;;  %2019 = vmatprep.mubr.bf16.mxu1 %v2771_v12 }
  0xa5   :  { %2033 = vmatprep.subr.bf16.mxu1 %v2291_v46 }
  0xa7   :  { %1988 = vmatmul.mubr.bf16.gmra.mrb[12].mxu0 %v2858_v41 }
  0xa8   :  { %2071 = vmatprep.mubr.bf16.mxu0 %v2737_v5  ;;  %2034 = vmatpush3.bf16.msra.mxu1 %v2291_v46 }
  0xa9   :  { %2035 = vmatprep.subr.bf16.mxu1 %v2292_v47 }
  0xab   :  { %2020 = vmatmul.mubr.bf16.gmra.mrb[12].mxu1 %v2784_v17 }
  0xac   :  { %2036 = vmatpush3.bf16.msra.mxu1 %v2292_v47 }
  0xad   :  { %2037 = vmatprep.subr.bf16.mxu1 %v2293_v48 }
  0xb0   :  { %2038 = vmatpush3.bf16.msra.mxu1 %v2293_v48  ;;  %v1795_v48 = vld [vmem:[%s3035_s5] ss:$0 sm:$0xff] }
  0xf0   :  { %v2869_v49 = vpop.permute.xlu0 %407 }
  0xf1   :  { %v2871_v50 = vpop.permute.xlu1 %417 }
  0xf4   :  { %v2873_v51 = vpop.permute.xlu0 %412 }
  0xf5   :  { %v2875_v52 = vpop.permute.xlu1 %422 }
  0xf8   :  { %v2877_v53 = vpop.permute.xlu0 %427 }
  0xf9   :  { %v2879_v54 = vpop.permute.xlu1 %432 }
  0xfc   :  { %v2881_v56 = vpop.permute.xlu0 %437 }
  0xfd   :  { %v2883_v58 = vpop.permute.xlu1 %442 }
 0x100   :  { %v2889_v3 = vpop.permute.xlu0 %447 }
 0x101   :  { %v2891_v4 = vpop.permute.xlu1 %452 }
 0x104   :  { %v2897_v13 = vpop.permute.xlu0 %457 }
 0x105   :  { %v2899_v15 = vpop.permute.xlu1 %462 }
 0x108   :  { %v2901_v20 = vpop.permute.xlu0 %467 }
 0x109   :  { %v2905_v26 = vpop.permute.xlu1 %472 }
 0x10c   :  { %v2909_v34 = vpop.permute.xlu0 %477 }
 0x10d   :  { %v2911_v36 = vpop.permute.xlu1 %482 }
 0x162   :  { %v1977_v55 = vpop.f32.mrb[0].mxu0 }
 0x163   :  { %v342_v57 = vpop.f32.mrb[1].mxu0  ;;  %v487_v60 = vmul.f32 %v1977_v55, %v2871_v50 }
 0x164   :  { %v1978_v59 = vpop.f32.mrb[2].mxu0  ;;  %v485_v63 = vmul.f32 %v2869_v49, %v342_v57 }
 0x165   :  { %v488_v61 = vmul.f32 %v1978_v59, %v2875_v52  ;;  %v345_v62 = vpop.f32.mrb[3].mxu0 }
 0x166   :  { %v486_v0 = vmul.f32 %v2873_v51, %v345_v62 }
 0x167   :  { %v502_v1 = vpack.c.bf16 %v488_v61, %v487_v60 }
 0x168   :  { %v501_v2 = vpack.c.bf16 %v486_v0, %v485_v63 }
 0x16a   :  { %v1981_v5 = vpop.f32.mrb[4].mxu0  ;;  %2039 = vmatprep.mubr.bf16.mxu1 %v501_v2 }
 0x16b   :  { %v358_v6 = vpop.f32.mrb[5].mxu0  ;;  %2040 = vmatmul.mubr.bf16.vlgmr.msra.gmra.mrb[0].mxu1 %v502_v1  ;;  %v491_v8 = vmul.f32 %v1981_v5, %v2881_v56 }
 0x16c   :  { %v1982_v7 = vpop.f32.mrb[6].mxu0  ;;  %v489_v11 = vmul.f32 %v2877_v53, %v358_v6 }
 0x16d   :  { %v492_v9 = vmul.f32 %v1982_v7, %v2883_v58  ;;  %v361_v10 = vpop.f32.mrb[7].mxu0 }
 0x16e   :  { %v490_v12 = vmul.f32 %v2879_v54, %v361_v10 }
 0x16f   :  { %v504_v14 = vpack.c.bf16 %v492_v9, %v491_v8 }
 0x170   :  { %v503_v16 = vpack.c.bf16 %v490_v12, %v489_v11 }
 0x172   :  { %v1985_v17 = vpop.f32.mrb[8].mxu0  ;;  %2043 = vmatprep.mubr.bf16.mxu1 %v503_v16 }
 0x173   :  { %v374_v18 = vpop.f32.mrb[9].mxu0  ;;  %2044 = vmatmul.mubr.bf16.gmra.mrb[4].mxu1 %v504_v14  ;;  %v495_v23 = vmul.f32 %v1985_v17, %v2897_v13 }
 0x174   :  { %v1986_v19 = vpop.f32.mrb[10].mxu0  ;;  %v493_v27 = vmul.f32 %v2889_v3, %v374_v18 }
 0x175   :  { %v496_v24 = vmul.f32 %v1986_v19, %v2899_v15  ;;  %v377_v25 = vpop.f32.mrb[11].mxu0 }
 0x176   :  { %v494_v28 = vmul.f32 %v2891_v4, %v377_v25 }
 0x177   :  { %v506_v30 = vpack.c.bf16 %v496_v24, %v495_v23 }
 0x178   :  { %v505_v31 = vpack.c.bf16 %v494_v28, %v493_v27 }
 0x17a   :  { %v1989_v33 = vpop.f32.mrb[12].mxu0  ;;  %2047 = vmatprep.mubr.bf16.mxu1 %v505_v31 }
 0x17b   :  { %v390_v35 = vpop.f32.mrb[13].mxu0  ;;  %2048 = vmatmul.mubr.bf16.gmra.mrb[8].mxu1 %v506_v30  ;;  %v499_v40 = vmul.f32 %v1989_v33, %v2909_v34 }
 0x17c   :  { %v1990_v39 = vpop.f32.mrb[14].mxu0  ;;  %v497_v44 = vmul.f32 %v2901_v20, %v390_v35 }
 0x17d   :  { %v500_v42 = vmul.f32 %v1990_v39, %v2911_v36  ;;  %v393_v43 = vpop.f32.mrb[15].mxu0 }
 0x17e   :  { %v498_v45 = vmul.f32 %v2905_v26, %v393_v43 }
 0x17f   :  { %v508_v46 = vpack.c.bf16 %v500_v42, %v499_v40 }
 0x180   :  { %v507_v47 = vpack.c.bf16 %v498_v45, %v497_v44 }
 0x182   :  { %2051 = vmatprep.mubr.bf16.mxu1 %v507_v47 }
 0x183   :  { %2052 = vmatmul.mubr.bf16.gmra.mrb[12].mxu1 %v508_v46 }
 0x23e   :  { %v2041_v55 = vpop.f32.mrb[0].mxu1 }
 0x23f   :  { %v807_v57 = vadd.f32 %v2041_v55, %v1795_v48  ;;  %v736_v59 = vpop.f32.mrb[1].mxu1 }
 0x240   :  { %v805_v60 = vadd.f32 %v1795_v48, %v736_v59  ;;  %v2042_v61 = vpop.f32.mrb[2].mxu1 }
 0x241   :  { %v808_v62 = vadd.f32 %v2042_v61, %v1795_v48  ;;  %v739_v63 = vpop.f32.mrb[3].mxu1  ;;  %v823_v1 = vmax.f32 %v807_v57, 0.0 }
 0x242   :  { %v806_v0 = vadd.f32 %v1795_v48, %v739_v63  ;;  %v821_v5 = vmax.f32 %v805_v60, 0.0 }
 0x243   :  { %v824_v2 = vmax.f32 %v808_v62, 0.0 }
 0x244   :  { %v822_v6 = vmax.f32 %v806_v0, 0.0 }
 0x245   :  { %v2920_v7 = vpack.c.bf16 %v824_v2, %v823_v1 }
 0x246   :  { %v2922_v8 = vpack.c.bf16 %v822_v6, %v821_v5  ;;  %v2045_v9 = vpop.f32.mrb[4].mxu1 }
 0x247   :  { %v811_v10 = vadd.f32 %v2045_v9, %v1795_v48  ;;  %v752_v11 = vpop.f32.mrb[5].mxu1 }
 0x248   :  { %v809_v12 = vadd.f32 %v1795_v48, %v752_v11  ;;  %v2046_v14 = vpop.f32.mrb[6].mxu1  ;;  %2055 = vmatprep.subr.bf16.mxu0 %v2922_v8 }
 0x249   :  { %v812_v16 = vadd.f32 %v2046_v14, %v1795_v48  ;;  %v755_v17 = vpop.f32.mrb[7].mxu1  ;;  %2056 = vmatpush3.bf16.msra.mxu0 %v2922_v8  ;;  %v827_v19 = vmax.f32 %v811_v10, 0.0  ;;  %v2294_v14 = vld [vmem:[#allocation8] sm:$0xff]  }
 0x24a   :  { %v810_v18 = vadd.f32 %v1795_v48, %v755_v17  ;;  %2057 = vmatprep.subr.bf16.mxu0 %v2920_v7  ;;  %v825_v24 = vmax.f32 %v809_v12, 0.0  ;;  %v2297_v17 = vld [vmem:[#allocation8 + $0x18] sm:$0xff]  }
 0x24b   :  { %v828_v23 = vmax.f32 %v812_v16, 0.0  ;;  %v2295_v16 = vld [vmem:[#allocation8 + $0x8] sm:$0xff]  }
 0x24c   :  { %v826_v25 = vmax.f32 %v810_v18, 0.0  ;;  %v2298_v18 = vld [vmem:[#allocation8 + $0x20] sm:$0xff]  }
 0x24d   :  { %v2927_v27 = vpack.c.bf16 %v828_v23, %v827_v19  ;;  %2058 = vmatpush3.bf16.msra.mxu0 %v2920_v7  ;;  %v2299_v19 = vld [vmem:[#allocation8 + $0x28] sm:$0xff]   ;;  %v2309_v23 = vld [vmem:[#allocation7 + $0x38] sm:$0xff]  }
 0x24e   :  { %v2930_v28 = vpack.c.bf16 %v826_v25, %v825_v24  ;;  %v2049_v30 = vpop.f32.mrb[8].mxu1  ;;  %v2310_v24 = vld [vmem:[#allocation10] sm:$0xff]   ;;  %v2311_v25 = vld [vmem:[#allocation10 + $0x8] sm:$0xff]  }
 0x24f   :  { %v815_v31 = vadd.f32 %v2049_v30, %v1795_v48  ;;  %v768_v33 = vpop.f32.mrb[9].mxu1  ;;  %2151 = vmatprep.subr.bf16.mxu1 %v2310_v24  ;;  %v2314_v30 = vld [vmem:[#allocation10 + $0x20] sm:$0xff]  }
 0x250   :  { %v813_v35 = vadd.f32 %v1795_v48, %v768_v33  ;;  %v2050_v39 = vpop.f32.mrb[10].mxu1  ;;  %2059 = vmatprep.subr.bf16.mxu0 %v2930_v28  ;;  %2152 = vmatpush3.bf16.msra.mxu1 %v2310_v24 }
 0x251   :  { %v816_v40 = vadd.f32 %v2050_v39, %v1795_v48  ;;  %v771_v42 = vpop.f32.mrb[11].mxu1  ;;  %2060 = vmatpush3.bf16.msra.mxu0 %v2930_v28  ;;  %v831_v44 = vmax.f32 %v815_v31, 0.0  ;;  %2153 = vmatprep.subr.bf16.mxu1 %v2311_v25  ;;  %v2315_v31 = vld [vmem:[#allocation10 + $0x28] sm:$0xff]  }
 0x252   :  { %v814_v43 = vadd.f32 %v1795_v48, %v771_v42  ;;  %2061 = vmatprep.subr.bf16.mxu0 %v2927_v27  ;;  %v829_v46 = vmax.f32 %v813_v35, 0.0 }
 0x253   :  { %v832_v45 = vmax.f32 %v816_v40, 0.0 }
 0x254   :  { %v830_v47 = vmax.f32 %v814_v43, 0.0  ;;  %2154 = vmatpush3.bf16.msra.mxu1 %v2311_v25 }
 0x255   :  { %v2935_v55 = vpack.c.bf16 %v832_v45, %v831_v44  ;;  %2062 = vmatpush3.bf16.msra.mxu0 %v2927_v27 }
 0x256   :  { %v2938_v57 = vpack.c.bf16 %v830_v47, %v829_v46  ;;  %v2053_v59 = vpop.f32.mrb[12].mxu1 }
 0x257   :  { %v819_v60 = vadd.f32 %v2053_v59, %v1795_v48  ;;  %v784_v61 = vpop.f32.mrb[13].mxu1 }
 0x258   :  { %v817_v62 = vadd.f32 %v1795_v48, %v784_v61  ;;  %v2054_v63 = vpop.f32.mrb[14].mxu1  ;;  %2063 = vmatprep.subr.bf16.mxu0 %v2938_v57 }
 0x259   :  { %v820_v0 = vadd.f32 %v2054_v63, %v1795_v48  ;;  %v787_v1 = vpop.f32.mrb[15].mxu1  ;;  %2064 = vmatpush3.bf16.msra.mxu0 %v2938_v57  ;;  %v835_v5 = vmax.f32 %v819_v60, 0.0 }
 0x25a   :  { %v818_v2 = vadd.f32 %v1795_v48, %v787_v1  ;;  %2065 = vmatprep.subr.bf16.mxu0 %v2935_v55  ;;  %v833_v9 = vmax.f32 %v817_v62, 0.0  ;;  %v2296_v48 = vld [vmem:[#allocation8 + $0x10] sm:$0xff]  }
 0x25b   :  { %v836_v6 = vmax.f32 %v820_v0, 0.0 }
 0x25c   :  { %v834_v10 = vmax.f32 %v818_v2, 0.0 }
 0x25d   :  { %v844_v11 = vpack.c.bf16 %v836_v6, %v835_v5  ;;  %2066 = vmatpush3.bf16.msra.mxu0 %v2935_v55 }
 0x25e   :  { %v843_v12 = vpack.c.bf16 %v834_v10, %v833_v9 }
 0x260   :  { %2067 = vmatprep.subr.bf16.mxu0 %v843_v12 }
 0x261   :  { %2068 = vmatpush3.bf16.msra.mxu0 %v843_v12 }
 0x262   :  { %2069 = vmatprep.subr.bf16.mxu0 %v844_v11 }
 0x265   :  { %2070 = vmatpush3.bf16.msra.mxu0 %v844_v11 }
 0x266   :  { %2087 = vmatprep.subr.bf16.mxu0 %v2294_v14 }
 0x268   :  { %2072 = vmatmul.mubr.bf16.vlgmr.msra.gmra.mrb[16].mxu0 %v2797_v21  ;;  %v2300_v21 = vld [vmem:[#allocation8 + $0x30] sm:$0xff]  }
 0x269   :  { %2088 = vmatpush3.bf16.msra.mxu0 %v2294_v14  ;;  %2075 = vmatprep.mubr.bf16.mxu0 %v2802_v22  ;;  %v2301_v22 = vld [vmem:[#allocation8 + $0x38] sm:$0xff]  }
 0x26a   :  { %2089 = vmatprep.subr.bf16.mxu0 %v2295_v16 }
 0x26d   :  { %2090 = vmatpush3.bf16.msra.mxu0 %v2295_v16 }
 0x26e   :  { %2091 = vmatprep.subr.bf16.mxu0 %v2296_v48 }
 0x270   :  { %2076 = vmatmul.mubr.bf16.gmra.mrb[20].mxu0 %v2822_v29  ;;  %v2302_v29 = vld [vmem:[#allocation7] sm:$0xff]  }
 0x271   :  { %2092 = vmatpush3.bf16.msra.mxu0 %v2296_v48  ;;  %2079 = vmatprep.mubr.bf16.mxu0 %v2833_v32  ;;  %v2303_v32 = vld [vmem:[#allocation7 + $0x8] sm:$0xff]  }
 0x272   :  { %2093 = vmatprep.subr.bf16.mxu0 %v2297_v17 }
 0x275   :  { %2094 = vmatpush3.bf16.msra.mxu0 %v2297_v17  ;;  %v2317_v17 = vld [vmem:[#allocation10 + $0x38] sm:$0xff]  }
 0x276   :  { %2095 = vmatprep.subr.bf16.mxu0 %v2298_v18 }
 0x278   :  { %2080 = vmatmul.mubr.bf16.gmra.mrb[24].mxu0 %v2846_v37  ;;  %v2304_v37 = vld [vmem:[#allocation7 + $0x10] sm:$0xff]  }
 0x279   :  { %2096 = vmatpush3.bf16.msra.mxu0 %v2298_v18  ;;  %2083 = vmatprep.mubr.bf16.mxu0 %v2851_v38  ;;  %v2305_v38 = vld [vmem:[#allocation7 + $0x18] sm:$0xff]   ;;  %v2318_v18 = vld [vmem:[#allocation11] sm:$0xff]  }
 0x27a   :  { %2097 = vmatprep.subr.bf16.mxu0 %v2299_v19 }
 0x27d   :  { %2098 = vmatpush3.bf16.msra.mxu0 %v2299_v19 }
 0x27e   :  { %2099 = vmatprep.subr.bf16.mxu0 %v2300_v21 }
 0x280   :  { %2084 = vmatmul.mubr.bf16.gmra.mrb[28].mxu0 %v2858_v41  ;;  %v2306_v41 = vld [vmem:[#allocation7 + $0x20] sm:$0xff]  }
 0x281   :  { %2100 = vmatpush3.bf16.msra.mxu0 %v2300_v21  ;;  %2103 = vmatprep.mubr.bf16.mxu0 %v2922_v8  ;;  %v2307_v8 = vld [vmem:[#allocation7 + $0x28] sm:$0xff]  }
 0x282   :  { %2101 = vmatprep.subr.bf16.mxu0 %v2301_v22 }
 0x285   :  { %2102 = vmatpush3.bf16.msra.mxu0 %v2301_v22 }
 0x286   :  { %2119 = vmatprep.subr.bf16.mxu0 %v2302_v29 }
 0x288   :  { %2104 = vmatmul.mubr.bf16.vlgmr.msra.gmra.mrb[32].mxu0 %v2920_v7  ;;  %v2308_v7 = vld [vmem:[#allocation7 + $0x30] sm:$0xff]  }
 0x289   :  { %2107 = vmatprep.mubr.bf16.mxu0 %v2930_v28  ;;  %2120 = vmatpush3.bf16.msra.mxu0 %v2302_v29  ;;  %v2313_v28 = vld [vmem:[#allocation10 + $0x18] sm:$0xff]  }
 0x28a   :  { %2121 = vmatprep.subr.bf16.mxu0 %v2303_v32 }
 0x28d   :  { %2122 = vmatpush3.bf16.msra.mxu0 %v2303_v32 }
 0x28e   :  { %2123 = vmatprep.subr.bf16.mxu0 %v2304_v37 }
 0x290   :  { %2108 = vmatmul.mubr.bf16.gmra.mrb[36].mxu0 %v2927_v27  ;;  %v2312_v27 = vld [vmem:[#allocation10 + $0x10] sm:$0xff]  }
 0x291   :  { %2111 = vmatprep.mubr.bf16.mxu0 %v2938_v57  ;;  %2124 = vmatpush3.bf16.msra.mxu0 %v2304_v37 }
 0x292   :  { %2125 = vmatprep.subr.bf16.mxu0 %v2305_v38  ;;  %2155 = vmatprep.subr.bf16.mxu1 %v2312_v27 }
 0x293   :  { %2156 = vmatpush3.bf16.msra.mxu1 %v2312_v27 }
 0x294   :  { %2157 = vmatprep.subr.bf16.mxu1 %v2313_v28 }
 0x295   :  { %2126 = vmatpush3.bf16.msra.mxu0 %v2305_v38 }
 0x296   :  { %2127 = vmatprep.subr.bf16.mxu0 %v2306_v41 }
 0x297   :  { %2158 = vmatpush3.bf16.msra.mxu1 %v2313_v28  ;;  %v2319_v28 = vld [vmem:[#allocation11 + $0x8] sm:$0xff]  }
 0x298   :  { %2112 = vmatmul.mubr.bf16.gmra.mrb[40].mxu0 %v2935_v55  ;;  %2159 = vmatprep.subr.bf16.mxu1 %v2314_v30 }
 0x299   :  { %2115 = vmatprep.mubr.bf16.mxu0 %v843_v12  ;;  %2128 = vmatpush3.bf16.msra.mxu0 %v2306_v41 }
 0x29a   :  { %2129 = vmatprep.subr.bf16.mxu0 %v2307_v8 }
 0x29b   :  { %2160 = vmatpush3.bf16.msra.mxu1 %v2314_v30 }
 0x29c   :  { %2161 = vmatprep.subr.bf16.mxu1 %v2315_v31 }
 0x29d   :  { %2130 = vmatpush3.bf16.msra.mxu0 %v2307_v8 }
 0x29e   :  { %2131 = vmatprep.subr.bf16.mxu0 %v2308_v7 }
 0x29f   :  { %2162 = vmatpush3.bf16.msra.mxu1 %v2315_v31 }
 0x2a0   :  { %2116 = vmatmul.mubr.bf16.gmra.mrb[44].mxu0 %v844_v11 }
 0x2a1   :  { %2132 = vmatpush3.bf16.msra.mxu0 %v2308_v7 }
 0x2a2   :  { %2133 = vmatprep.subr.bf16.mxu0 %v2309_v23 }
 0x2a5   :  { %2134 = vmatpush3.bf16.msra.mxu0 %v2309_v23 }
 0x33b   :  { %v2073_v33 = vpop.f32.mrb[16].mxu0 }
 0x33c   :  { %v912_v35 = vpop.f32.mrb[17].mxu0  ;;  %v977_v40 = vmul.f32 %v2073_v33, %v2871_v50 }
 0x33d   :  { %v2074_v39 = vpop.f32.mrb[18].mxu0  ;;  %v975_v44 = vmul.f32 %v912_v35, %v2869_v49 }
 0x33e   :  { %v978_v42 = vmul.f32 %v2074_v39, %v2875_v52  ;;  %v915_v43 = vpop.f32.mrb[19].mxu0 }
 0x33f   :  { %v976_v45 = vmul.f32 %v915_v43, %v2873_v51  ;;  %v2320_v43 = vld [vmem:[#allocation11 + $0x10] sm:$0xff]  }
 0x340   :  { %v992_v46 = vpack.c.bf16 %v978_v42, %v977_v40 }
 0x341   :  { %v991_v47 = vpack.c.bf16 %v976_v45, %v975_v44 }
 0x343   :  { %v2077_v55 = vpop.f32.mrb[20].mxu0  ;;  %2135 = vmatprep.mubr.bf16.mxu0 %v991_v47 }
 0x344   :  { %v928_v57 = vpop.f32.mrb[21].mxu0  ;;  %2136 = vmatmul.mubr.bf16.vlgmr.msra.gmra.mrb[32].mxu0 %v992_v46  ;;  %v981_v60 = vmul.f32 %v2077_v55, %v2881_v56 }
 0x345   :  { %v2078_v59 = vpop.f32.mrb[22].mxu0  ;;  %v979_v50 = vmul.f32 %v928_v57, %v2877_v53 }
 0x346   :  { %v982_v61 = vmul.f32 %v2078_v59, %v2883_v58  ;;  %v931_v62 = vpop.f32.mrb[23].mxu0 }
 0x347   :  { %v980_v52 = vmul.f32 %v931_v62, %v2879_v54 }
 0x348   :  { %v994_v63 = vpack.c.bf16 %v982_v61, %v981_v60  ;;  %v2321_v60 = vld [vmem:[#allocation11 + $0x18] sm:$0xff]  }
 0x349   :  { %v993_v49 = vpack.c.bf16 %v980_v52, %v979_v50 }
 0x34b   :  { %v2081_v0 = vpop.f32.mrb[24].mxu0  ;;  %2139 = vmatprep.mubr.bf16.mxu0 %v993_v49 }
 0x34c   :  { %v944_v51 = vpop.f32.mrb[25].mxu0  ;;  %2140 = vmatmul.mubr.bf16.gmra.mrb[36].mxu0 %v994_v63  ;;  %v985_v2 = vmul.f32 %v2081_v0, %v2897_v13 }
 0x34d   :  { %v2082_v1 = vpop.f32.mrb[26].mxu0  ;;  %v983_v56 = vmul.f32 %v944_v51, %v2889_v3  ;;  %v2322_v51 = vld [vmem:[#allocation11 + $0x20] sm:$0xff]  }
 0x34e   :  { %v986_v5 = vmul.f32 %v2082_v1, %v2899_v15  ;;  %v947_v6 = vpop.f32.mrb[27].mxu0 }
 0x34f   :  { %v984_v58 = vmul.f32 %v947_v6, %v2891_v4  ;;  %v2316_v4 = vld [vmem:[#allocation10 + $0x30] sm:$0xff]  }
 0x350   :  { %v996_v9 = vpack.c.bf16 %v986_v5, %v985_v2  ;;  %2163 = vmatprep.subr.bf16.mxu1 %v2316_v4 }
 0x351   :  { %v995_v53 = vpack.c.bf16 %v984_v58, %v983_v56  ;;  %2164 = vmatpush3.bf16.msra.mxu1 %v2316_v4 }
 0x352   :  { %2165 = vmatprep.subr.bf16.mxu1 %v2317_v17 }
 0x353   :  { %v2085_v10 = vpop.f32.mrb[28].mxu0  ;;  %2143 = vmatprep.mubr.bf16.mxu0 %v995_v53  ;;  %v2323_v53 = vld [vmem:[#allocation11 + $0x28] sm:$0xff]  }
 0x354   :  { %v960_v54 = vpop.f32.mrb[29].mxu0  ;;  %2144 = vmatmul.mubr.bf16.gmra.mrb[40].mxu0 %v996_v9  ;;  %v989_v12 = vmul.f32 %v2085_v10, %v2909_v34  ;;  %v2976_v34 = vld [vmem:[%s3038_s8] ss:$0 sm:$0xff] }
 0x355   :  { %v2086_v11 = vpop.f32.mrb[30].mxu0  ;;  %v987_v13 = vmul.f32 %v960_v54, %v2901_v20  ;;  %2166 = vmatpush3.bf16.msra.mxu1 %v2317_v17  ;;  %v2324_v17 = vld [vmem:[#allocation11 + $0x30] sm:$0xff]  }
 0x356   :  { %v990_v14 = vmul.f32 %v2086_v11, %v2911_v36  ;;  %v963_v16 = vpop.f32.mrb[31].mxu0  ;;  %2183 = vmatprep.subr.bf16.mxu1 %v2318_v18 }
 0x357   :  { %v988_v15 = vmul.f32 %v963_v16, %v2905_v26 }
 0x358   :  { %v998_v48 = vpack.c.bf16 %v990_v14, %v989_v12 }
 0x359   :  { %v997_v3 = vpack.c.bf16 %v988_v15, %v987_v13 }
 0x35b   :  { %2147 = vmatprep.mubr.bf16.mxu0 %v997_v3 }
 0x35c   :  { %2148 = vmatmul.mubr.bf16.gmra.mrb[44].mxu0 %v998_v48 }
 0x417   :  { %v2137_v20 = vpop.f32.mrb[32].mxu0 }
 0x418   :  { %v1297_v26 = vadd.f32 %v2137_v20, %v2976_v34  ;;  %v1226_v36 = vpop.f32.mrb[33].mxu0 }
 0x419   :  { %v1295_v19 = vadd.f32 %v2976_v34, %v1226_v36  ;;  %v2138_v21 = vpop.f32.mrb[34].mxu0 }
 0x41a   :  { %1337 = vst [vmem:[#allocation13 + $0x10] sm:$0xff] %v1297_v26  ;;  %v1298_v22 = vadd.f32 %v2138_v21, %v2976_v34  ;;  %v1229_v29 = vpop.f32.mrb[35].mxu0  ;;  %v1313_v37 = vmax.f32 %v1297_v26, 0.0 }
 0x41b   :  { %1335 = vst [vmem:[#allocation13] sm:$0xff] %v1295_v19  ;;  %v1296_v32 = vadd.f32 %v2976_v34, %v1229_v29  ;;  %v1311_v41 = vmax.f32 %v1295_v19, 0.0 }
 0x41c   :  { %v1314_v38 = vmax.f32 %v1298_v22, 0.0  ;;  %1338 = vst [vmem:[#allocation13 + $0x18] sm:$0xff] %v1298_v22 }
 0x41d   :  { %v1312_v8 = vmax.f32 %v1296_v32, 0.0  ;;  %1336 = vst [vmem:[#allocation13 + $0x8] sm:$0xff] %v1296_v32 }
 0x41e   :  { %v1328_v7 = vpack.c.bf16 %v1314_v38, %v1313_v37 }
 0x41f   :  { %v2141_v23 = vpop.f32.mrb[36].mxu0  ;;  %v1327_v24 = vpack.c.bf16 %v1312_v8, %v1311_v41 }
 0x420   :  { %v1301_v25 = vadd.f32 %v2141_v23, %v2976_v34  ;;  %v1242_v27 = vpop.f32.mrb[37].mxu0 }
 0x421   :  { %v1299_v30 = vadd.f32 %v2976_v34, %v1242_v27  ;;  %v2142_v31 = vpop.f32.mrb[38].mxu0  ;;  %2167 = vmatprep.mubr.bf16.mxu1 %v1327_v24 }
 0x422   :  { %1341 = vst [vmem:[#allocation13 + $0x30] sm:$0xff] %v1301_v25  ;;  %v1302_v33 = vadd.f32 %v2142_v31, %v2976_v34  ;;  %v1245_v35 = vpop.f32.mrb[39].mxu0  ;;  %2168 = vmatmul.mubr.bf16.vlgmr.msra.gmra.mrb[16].mxu1 %v1328_v7  ;;  %v1317_v40 = vmax.f32 %v1301_v25, 0.0 }
 0x423   :  { %1339 = vst [vmem:[#allocation13 + $0x20] sm:$0xff] %v1299_v30  ;;  %v1300_v39 = vadd.f32 %v2976_v34, %v1245_v35  ;;  %2184 = vmatpush3.bf16.msra.mxu1 %v2318_v18  ;;  %v1315_v44 = vmax.f32 %v1299_v30, 0.0  ;;  %v2325_v18 = vld [vmem:[#allocation11 + $0x38] sm:$0xff]  }
 0x424   :  { %v1318_v42 = vmax.f32 %v1302_v33, 0.0  ;;  %1342 = vst [vmem:[#allocation13 + $0x38] sm:$0xff] %v1302_v33  ;;  %2185 = vmatprep.subr.bf16.mxu1 %v2319_v28 }
 0x425   :  { %v1316_v45 = vmax.f32 %v1300_v39, 0.0  ;;  %1340 = vst [vmem:[#allocation13 + $0x28] sm:$0xff] %v1300_v39 }
 0x426   :  { %v1330_v46 = vpack.c.bf16 %v1318_v42, %v1317_v40 }
 0x427   :  { %v2145_v47 = vpop.f32.mrb[40].mxu0  ;;  %v1329_v55 = vpack.c.bf16 %v1316_v45, %v1315_v44  ;;  %2186 = vmatpush3.bf16.msra.mxu1 %v2319_v28 }
 0x428   :  { %v1305_v57 = vadd.f32 %v2145_v47, %v2976_v34  ;;  %v1258_v59 = vpop.f32.mrb[41].mxu0  ;;  %2187 = vmatprep.subr.bf16.mxu1 %v2320_v43 }
 0x429   :  { %v1303_v61 = vadd.f32 %v2976_v34, %v1258_v59  ;;  %v2146_v62 = vpop.f32.mrb[42].mxu0  ;;  %2171 = vmatprep.mubr.bf16.mxu1 %v1329_v55 }
 0x42a   :  { %1345 = vst [vmem:[#allocation13 + $0x50] sm:$0xff] %v1305_v57  ;;  %v1306_v50 = vadd.f32 %v2146_v62, %v2976_v34  ;;  %v1261_v52 = vpop.f32.mrb[43].mxu0  ;;  %2172 = vmatmul.mubr.bf16.gmra.mrb[20].mxu1 %v1330_v46  ;;  %v1321_v49 = vmax.f32 %v1305_v57, 0.0 }
 0x42b   :  { %1343 = vst [vmem:[#allocation13 + $0x40] sm:$0xff] %v1303_v61  ;;  %v1304_v63 = vadd.f32 %v2976_v34, %v1261_v52  ;;  %2188 = vmatpush3.bf16.msra.mxu1 %v2320_v43  ;;  %v1319_v1 = vmax.f32 %v1303_v61, 0.0 }
 0x42c   :  { %v1322_v0 = vmax.f32 %v1306_v50, 0.0  ;;  %1346 = vst [vmem:[#allocation13 + $0x58] sm:$0xff] %v1306_v50  ;;  %2189 = vmatprep.subr.bf16.mxu1 %v2321_v60 }
 0x42d   :  { %v1320_v2 = vmax.f32 %v1304_v63, 0.0  ;;  %1344 = vst [vmem:[#allocation13 + $0x48] sm:$0xff] %v1304_v63 }
 0x42e   :  { %v1332_v5 = vpack.c.bf16 %v1322_v0, %v1321_v49 }
 0x42f   :  { %v2149_v6 = vpop.f32.mrb[44].mxu0  ;;  %v1331_v56 = vpack.c.bf16 %v1320_v2, %v1319_v1  ;;  %2190 = vmatpush3.bf16.msra.mxu1 %v2321_v60 }
 0x430   :  { %v1309_v58 = vadd.f32 %v2149_v6, %v2976_v34  ;;  %v1274_v9 = vpop.f32.mrb[45].mxu0  ;;  %2191 = vmatprep.subr.bf16.mxu1 %v2322_v51 }
 0x431   :  { %v1307_v10 = vadd.f32 %v2976_v34, %v1274_v9  ;;  %v2150_v54 = vpop.f32.mrb[46].mxu0  ;;  %2175 = vmatprep.mubr.bf16.mxu1 %v1331_v56 }
 0x432   :  { %1349 = vst [vmem:[#allocation13 + $0x70] sm:$0xff] %v1309_v58  ;;  %v1310_v11 = vadd.f32 %v2150_v54, %v2976_v34  ;;  %v1277_v12 = vpop.f32.mrb[47].mxu0  ;;  %2176 = vmatmul.mubr.bf16.gmra.mrb[24].mxu1 %v1332_v5  ;;  %v1325_v16 = vmax.f32 %v1309_v58, 0.0 }
 0x433   :  { %1347 = vst [vmem:[#allocation13 + $0x60] sm:$0xff] %v1307_v10  ;;  %v1308_v14 = vadd.f32 %v2976_v34, %v1277_v12  ;;  %2192 = vmatpush3.bf16.msra.mxu1 %v2322_v51  ;;  %v1323_v15 = vmax.f32 %v1307_v10, 0.0  ;;  %v1813_v34 = vld [vmem:[%s3040_s10] ss:$0 sm:$0xff]  ;;  %s2523_s10 = smov [#allocation13]  }
 0x434   :  { %v1326_v13 = vmax.f32 %v1310_v11, 0.0  ;;  %1350 = vst [vmem:[#allocation13 + $0x78] sm:$0xff] %v1310_v11  ;;  %2193 = vmatprep.subr.bf16.mxu1 %v2323_v53  ;;  %s1732_s9 = sshll.u32 %s2523_s10, 4  ;;  %s1733_s9 = int_to_ptr.vmem [resolvable:$true] %s1732_s9 }
 0x435   :  { %v1324_v48 = vmax.f32 %v1308_v14, 0.0  ;;  %1348 = vst [vmem:[#allocation13 + $0x68] sm:$0xff] %v1308_v14  ;;  %s2458_s20 = scalar_lea.vmem %s1733_s9, 2048  ;;  %p2463_p7 = scmp.lt.s32.totalorder %s1733_s9, %s1733_s9 }
 0x436   :  { %v1334_v3 = vpack.c.bf16 %v1326_v13, %v1325_v16  ;;  %p2459_p6 = scmp.ne.s32.totalorder %s1733_s9, %s2458_s20  ;;  %p2464_p8 = scmp.lt.s32.totalorder %s2458_s20, %s2458_s20 }
 0x437   :  { %v1333_v4 = vpack.c.bf16 %v1324_v48, %v1323_v15  ;;  %2194 = vmatpush3.bf16.msra.mxu1 %v2323_v53 }
 0x438   :  { %2195 = vmatprep.subr.bf16.mxu1 %v2324_v17  ;;  %p2465_p9 = por %p2464_p8, %p2463_p7 }
 0x439   :  { %2179 = vmatprep.mubr.bf16.mxu1 %v1333_v4 }
 0x43a   :  { %2180 = vmatmul.mubr.bf16.gmra.mrb[28].mxu1 %v1334_v3  ;;  %p2466_p10 = pnand %p2465_p9, %p2459_p6 }
 0x43b   :  { %2196 = vmatpush3.bf16.msra.mxu1 %v2324_v17 }
 0x43c   :  { %2197 = vmatprep.subr.bf16.mxu1 %v2325_v18 }
 0x43f   :  { %2198 = vmatpush3.bf16.msra.mxu1 %v2325_v18 }
 0x4f5   :  { %v2169_v20 = vpop.f32.mrb[16].mxu1 }
 0x4f6   :  { %v1465_v26 = vadd.f32 %v2169_v20, %v1813_v34  ;;  %v1456_v36 = vpop.f32.mrb[17].mxu1 }
 0x4f7   :  { %v1457_v19 = vadd.f32 %v1813_v34, %v1456_v36  ;;  %v2170_v21 = vpop.f32.mrb[18].mxu1 }
 0x4f8   :  { %v1468_v22 = vadd.f32 %v2170_v21, %v1813_v34  ;;  %v1459_v29 = vpop.f32.mrb[19].mxu1  ;;  %v1521_v37 = vmax.f32 %v1465_v26, 0.0 }
 0x4f9   :  { %v1460_v32 = vadd.f32 %v1813_v34, %v1459_v29  ;;  %v1519_v41 = vmax.f32 %v1457_v19, 0.0 }
 0x4fa   :  { %v1522_v38 = vmax.f32 %v1468_v22, 0.0 }
 0x4fb   :  { %v1520_v8 = vmax.f32 %v1460_v32, 0.0 }
 0x4fc   :  { %v1536_v7 = vpack.c.bf16 %v1522_v38, %v1521_v37 }
 0x4fd   :  { %v1535_v23 = vpack.c.bf16 %v1520_v8, %v1519_v41  ;;  %v2173_v24 = vpop.f32.mrb[20].mxu1 }
 0x4fe   :  { %v1481_v25 = vadd.f32 %v2173_v24, %v1813_v34  ;;  %v1472_v27 = vpop.f32.mrb[21].mxu1 }
 0x4ff   :  { %v1473_v28 = vadd.f32 %v1813_v34, %v1472_v27  ;;  %v2174_v30 = vpop.f32.mrb[22].mxu1  ;;  %2199 = vmatprep.mubr.bf16.mxu1 %v1535_v23 }
 0x500   :  { %v1484_v31 = vadd.f32 %v2174_v30, %v1813_v34  ;;  %v1475_v33 = vpop.f32.mrb[23].mxu1  ;;  %2200 = vmatmul.mubr.bf16.vlgmr.msra.gmra.mrb[32].mxu1 %v1536_v7  ;;  %v1525_v39 = vmax.f32 %v1481_v25, 0.0 }
 0x501   :  { %v1476_v35 = vadd.f32 %v1813_v34, %v1475_v33  ;;  %v1523_v42 = vmax.f32 %v1473_v28, 0.0 }
 0x502   :  { %v1526_v40 = vmax.f32 %v1484_v31, 0.0 }
 0x503   :  { %v1524_v43 = vmax.f32 %v1476_v35, 0.0 }
 0x504   :  { %v1538_v44 = vpack.c.bf16 %v1526_v40, %v1525_v39 }
 0x505   :  { %v1537_v45 = vpack.c.bf16 %v1524_v43, %v1523_v42  ;;  %v2177_v46 = vpop.f32.mrb[24].mxu1 }
 0x506   :  { %v1497_v47 = vadd.f32 %v2177_v46, %v1813_v34  ;;  %v1488_v55 = vpop.f32.mrb[25].mxu1 }
 0x507   :  { %v1489_v57 = vadd.f32 %v1813_v34, %v1488_v55  ;;  %v2178_v59 = vpop.f32.mrb[26].mxu1  ;;  %2203 = vmatprep.mubr.bf16.mxu1 %v1537_v45 }
 0x508   :  { %v1500_v60 = vadd.f32 %v2178_v59, %v1813_v34  ;;  %v1491_v61 = vpop.f32.mrb[27].mxu1  ;;  %2204 = vmatmul.mubr.bf16.gmra.mrb[36].mxu1 %v1538_v44  ;;  %v1529_v50 = vmax.f32 %v1497_v47, 0.0 }
 0x509   :  { %v1492_v62 = vadd.f32 %v1813_v34, %v1491_v61  ;;  %v1527_v63 = vmax.f32 %v1489_v57, 0.0 }
 0x50a   :  { %v1530_v52 = vmax.f32 %v1500_v60, 0.0 }
 0x50b   :  { %v1528_v49 = vmax.f32 %v1492_v62, 0.0 }
 0x50c   :  { %v1540_v0 = vpack.c.bf16 %v1530_v52, %v1529_v50 }
 0x50d   :  { %v1539_v51 = vpack.c.bf16 %v1528_v49, %v1527_v63  ;;  %v2181_v1 = vpop.f32.mrb[28].mxu1 }
 0x50e   :  { %v1513_v2 = vadd.f32 %v2181_v1, %v1813_v34  ;;  %v1504_v5 = vpop.f32.mrb[29].mxu1 }
 0x50f   :  { %v1505_v6 = vadd.f32 %v1813_v34, %v1504_v5  ;;  %v2182_v56 = vpop.f32.mrb[30].mxu1  ;;  %2207 = vmatprep.mubr.bf16.mxu1 %v1539_v51 }
 0x510   :  { %v1516_v58 = vadd.f32 %v2182_v56, %v1813_v34  ;;  %v1507_v9 = vpop.f32.mrb[31].mxu1  ;;  %2208 = vmatmul.mubr.bf16.gmra.mrb[40].mxu1 %v1540_v0  ;;  %v1533_v10 = vmax.f32 %v1513_v2, 0.0 }
 0x511   :  { %v1508_v53 = vadd.f32 %v1813_v34, %v1507_v9  ;;  %v1531_v11 = vmax.f32 %v1505_v6, 0.0 }
 0x512   :  { %v1534_v54 = vmax.f32 %v1516_v58, 0.0 }
 0x513   :  { %v1532_v12 = vmax.f32 %v1508_v53, 0.0 }
 0x514   :  { %v1542_v14 = vpack.c.bf16 %v1534_v54, %v1533_v10 }
 0x515   :  { %v1541_v16 = vpack.c.bf16 %v1532_v12, %v1531_v11 }
 0x517   :  { %2211 = vmatprep.mubr.bf16.mxu1 %v1541_v16 }
 0x518   :  { %2212 = vmatmul.mubr.bf16.gmra.mrb[44].mxu1 %v1542_v14 }
 0x519   :  { %2469 = shalt.err (!%p2466_p10)
}
 0x51a   :  { %s2470_s23 = scalar_lea.hbm %s3043_s13, 2048 }
 0x51b   :  { %p2471_p11 = scmp.ne.s32.totalorder %s3043_s13, %s2470_s23  ;;  %p2474_p12 = scmp.lt.u32.totalorder %s2470_s23, %s3043_s13 }
 0x51d   :  { %p2476_p13 = pnand %p2474_p12, %p2471_p11 }
 0x51f   :  { %2479 = shalt.err (!%p2476_p13)
}
 0x520   :  { %s2524_s7 = smov 128   ;;  %s2525_s29 = smov 8   ;;  %v1822_v13 = vld [vmem:[%s3042_s12] ss:$0 sm:$0xff] }
 0x521   :  { %1738 = dma.vmem_to_hbm [thread:$0]  %s1733_s9, 2048, %s3043_s13, [#allocation4], %s2524_s7, %s2524_s7, %s2525_s29  }
 0x522   :  { %s2526_s12 = smov [#allocation14]  }
 0x523   :  { %s1744_s13 = sshll.u32 %s2526_s12, 4  ;;  %s1745_s13 = int_to_ptr.vmem [resolvable:$true] %s1744_s13 }
 0x524   :  { %s2480_s17 = scalar_lea.vmem %s1745_s13, 2048  ;;  %p2485_p1 = scmp.lt.s32.totalorder %s1745_s13, %s1745_s13 }
 0x525   :  { %p2481_p0 = scmp.ne.s32.totalorder %s1745_s13, %s2480_s17  ;;  %p2486_p2 = scmp.lt.s32.totalorder %s2480_s17, %s2480_s17 }
 0x527   :  { %p2487_p3 = por %p2486_p2, %p2485_p1 }
 0x529   :  { %p2488_p4 = pnand %p2487_p3, %p2481_p0 }
 0x5d3   :  { %v2201_v15 = vpop.f32.mrb[32].mxu1 }
 0x5d4   :  { %v1657_v48 = vadd.f32 %v2201_v15, %v1822_v13  ;;  %v1648_v3 = vpop.f32.mrb[33].mxu1 }
 0x5d5   :  { %v1649_v4 = vadd.f32 %v1822_v13, %v1648_v3  ;;  %v2202_v17 = vpop.f32.mrb[34].mxu1 }
 0x5d6   :  { %1713 = vst [vmem:[#allocation14 + $0x10] sm:$0xff] %v1657_v48  ;;  %v1660_v18 = vadd.f32 %v2202_v17, %v1822_v13  ;;  %v1651_v34 = vpop.f32.mrb[35].mxu1 }
 0x5d7   :  { %1711 = vst [vmem:[#allocation14] sm:$0xff] %v1649_v4  ;;  %v1652_v20 = vadd.f32 %v1822_v13, %v1651_v34 }
 0x5d8   :  { %1714 = vst [vmem:[#allocation14 + $0x18] sm:$0xff] %v1660_v18 }
 0x5d9   :  { %1712 = vst [vmem:[#allocation14 + $0x8] sm:$0xff] %v1652_v20 }
 0x5db   :  { %v2205_v26 = vpop.f32.mrb[36].mxu1 }
 0x5dc   :  { %v1673_v36 = vadd.f32 %v2205_v26, %v1822_v13  ;;  %v1664_v19 = vpop.f32.mrb[37].mxu1 }
 0x5dd   :  { %v1665_v21 = vadd.f32 %v1822_v13, %v1664_v19  ;;  %v2206_v22 = vpop.f32.mrb[38].mxu1 }
 0x5de   :  { %1717 = vst [vmem:[#allocation14 + $0x30] sm:$0xff] %v1673_v36  ;;  %v1676_v29 = vadd.f32 %v2206_v22, %v1822_v13  ;;  %v1667_v32 = vpop.f32.mrb[39].mxu1 }
 0x5df   :  { %1715 = vst [vmem:[#allocation14 + $0x20] sm:$0xff] %v1665_v21  ;;  %v1668_v37 = vadd.f32 %v1822_v13, %v1667_v32 }
 0x5e0   :  { %1718 = vst [vmem:[#allocation14 + $0x38] sm:$0xff] %v1676_v29 }
 0x5e1   :  { %1716 = vst [vmem:[#allocation14 + $0x28] sm:$0xff] %v1668_v37 }
 0x5e3   :  { %v2209_v38 = vpop.f32.mrb[40].mxu1 }
 0x5e4   :  { %v1689_v41 = vadd.f32 %v2209_v38, %v1822_v13  ;;  %v1680_v8 = vpop.f32.mrb[41].mxu1 }
 0x5e5   :  { %v1681_v7 = vadd.f32 %v1822_v13, %v1680_v8  ;;  %v2210_v23 = vpop.f32.mrb[42].mxu1 }
 0x5e6   :  { %1721 = vst [vmem:[#allocation14 + $0x50] sm:$0xff] %v1689_v41  ;;  %v1692_v24 = vadd.f32 %v2210_v23, %v1822_v13  ;;  %v1683_v25 = vpop.f32.mrb[43].mxu1 }
 0x5e7   :  { %1719 = vst [vmem:[#allocation14 + $0x40] sm:$0xff] %v1681_v7  ;;  %v1684_v27 = vadd.f32 %v1822_v13, %v1683_v25 }
 0x5e8   :  { %1722 = vst [vmem:[#allocation14 + $0x58] sm:$0xff] %v1692_v24 }
 0x5e9   :  { %1720 = vst [vmem:[#allocation14 + $0x48] sm:$0xff] %v1684_v27 }
 0x5eb   :  { %v2213_v28 = vpop.f32.mrb[44].mxu1 }
 0x5ec   :  { %v1705_v30 = vadd.f32 %v2213_v28, %v1822_v13  ;;  %v1696_v31 = vpop.f32.mrb[45].mxu1 }
 0x5ed   :  { %v1697_v33 = vadd.f32 %v1822_v13, %v1696_v31  ;;  %v2214_v35 = vpop.f32.mrb[46].mxu1 }
 0x5ee   :  { %1725 = vst [vmem:[#allocation14 + $0x70] sm:$0xff] %v1705_v30  ;;  %v1708_v39 = vadd.f32 %v2214_v35, %v1822_v13  ;;  %v1699_v40 = vpop.f32.mrb[47].mxu1 }
 0x5ef   :  { %1723 = vst [vmem:[#allocation14 + $0x60] sm:$0xff] %v1697_v33  ;;  %v1700_v42 = vadd.f32 %v1822_v13, %v1699_v40 }
 0x5f0   :  { %1726 = vst [vmem:[#allocation14 + $0x78] sm:$0xff] %v1708_v39 }
 0x5f1   :  { %1724 = vst [vmem:[#allocation14 + $0x68] sm:$0xff] %v1700_v42 }
 0x5f2   :  { %2491 = shalt.err (!%p2488_p4)
}
 0x5f3   :  { %s2492_s24 = scalar_lea.hbm %s3044_s14, 2048 }
 0x5f4   :  { %p2493_p5 = scmp.ne.s32.totalorder %s3044_s14, %s2492_s24  ;;  %p2496_p6 = scmp.lt.u32.totalorder %s2492_s24, %s3044_s14 }
 0x5f6   :  { %p2498_p7 = pnand %p2496_p6, %p2493_p5 }
 0x5f8   :  { %2501 = shalt.err (!%p2498_p7)
}
 0x5f9   :  { %1750 = dma.vmem_to_hbm [thread:$0]  %s1745_s13, 2048, %s3044_s14, [#allocation15], %s2524_s7, %s2524_s7, %s2525_s29  }
 0x5fa   :  { %2510 = dma.done.wait [#allocation4], 2048  }
 0x5fb   :  { %2511 = vsyncadd [#allocation4], 4294965248 }
 0x5fc   :  { %2512 = dma.done.wait [#allocation15], 2048  }
 0x5fd   :  { %2513 = vsyncadd [#allocation15], 4294965248 }
 0x5fe   :  { %1757 = vsyncpa [#allocation3], 1 }
 0x5ff   :  { %1758 = vsyncpa [#allocation6], 1 }
 0x600   :  { %1759 = vsyncpa [#allocation9], 1 }
 0x601   :  { %1760 = vsyncpa [#allocation12], 1 }
 0x602   :  { %1761 = vsyncpa [#allocation4], 1 }
 0x603   :  { %1762 = vsyncpa [#allocation15], 1 }

</bundles_post_ra>
